<compile_context>
chip_gen: v7x
topology: tpu7x:2x2x1
jax: 0.10.0
libtpu: 0.0.40
codegen_flags: <defaults>
</compile_context>

<pallas_src>
import functools

import jax
import jax.numpy as jnp
from jax import lax
from jax.experimental import pallas as pl
from jax.experimental.pallas import tpu as pltpu

HIDDEN_LSTM = 128
HIDDEN_FFN1 = 256
HIDDEN_FFN2 = 64
OUTPUT_DIM = 4

SELU_ALPHA = 1.6732632423543772848170429916717
SELU_SCALE = 1.0507009873554804934193349852946


def _selu(x):
    # torch.nn.SELU semantics (exp guarded so the positive branch never overflows)
    return SELU_SCALE * jnp.where(
        x > 0, x, SELU_ALPHA * (jnp.exp(jnp.minimum(x, 0.0)) - 1.0)
    )


def _policy_kernel(seq_len,
                   x_ref,       # VMEM (BB, T)  f32 : BB independent sequences, 1 scalar/step
                   w_ih_ref,    # VMEM (1, 4H)  f32 : LSTM W_ih row  (g slice pre-scaled x2)
                   w_hh_ref,    # VMEM (H, 4H)  bf16: LSTM W_hh^T    (g cols  pre-scaled x2)
                   b_lstm_ref,  # VMEM (1, 4H)  f32 : b_ih + b_hh    (g slice pre-scaled x2)
                   w1_ref,      # VMEM (H, 256) bf16
                   b1_ref,      # VMEM (1, 256) f32
                   w2_ref,      # VMEM (256,64) bf16
                   b2_ref,      # VMEM (1, 64)  f32
                   w3_ref,      # VMEM (64, 4)  bf16
                   b3_ref,      # VMEM (1, 4)   f32
                   out_ref):    # VMEM (BB, 4)  f32
    H = HIDDEN_LSTM
    bb = x_ref.shape[0]

    w_ih = w_ih_ref[...]       # (1, 4H)  small, fine to hold
    b_lstm = b_lstm_ref[...]   # (1, 4H)

    h = jnp.zeros((bb, H), jnp.float32)
    c = jnp.zeros((bb, H), jnp.float32)

    # Fully unrolled recurrence (seq_len is a static Python int) -> full LLO visibility.
    # W_hh is read from its VMEM ref inside the dot (not hoisted into vregs).
    for t in range(seq_len):
        x_t = x_ref[:, t:t + 1]                       # (BB, 1)
        gates = (x_t * w_ih + b_lstm
                 + jnp.dot(h.astype(jnp.bfloat16), w_hh_ref[...],
                           preferred_element_type=jnp.float32))   # (BB, 4H)
        # One sigmoid over the whole slab; g slice was pre-scaled by 2, so
        # tanh(g) = 2*sigmoid(2g) - 1 recovers the exact cell-input gate.
        sig = jax.nn.sigmoid(gates)
        i_g = sig[:, 0:H]
        f_g = sig[:, H:2 * H]
        g_t = 2.0 * sig[:, 2 * H:3 * H] - 1.0
        o_g = sig[:, 3 * H:4 * H]
        c = f_g * c + i_g * g_t
        h = o_g * jnp.tanh(c)

    # Feed-forward head on the last hidden state.
    z = jnp.dot(h.astype(jnp.bfloat16), w1_ref[...],
                preferred_element_type=jnp.float32) + b1_ref[...]
    z = _selu(z)
    z = jnp.dot(z.astype(jnp.bfloat16), w2_ref[...],
                preferred_element_type=jnp.float32) + b2_ref[...]
    z = _selu(z)
    out_ref[...] = jnp.dot(z.astype(jnp.bfloat16), w3_ref[...],
                           preferred_element_type=jnp.float32) + b3_ref[...]


def policy_forward(x, kparams, *, block_b=256):
    """Pallas equivalent of PolicyNetwork.forward, batched over independent states.

    x: (T,) single state (module's x.view(1,-1,1) path) -> returns (1, 4), or
       (B, T) batch of independent states -> returns (B, 4).
    block_b: batch tile per grid step (multiple of 8; 128 fills MXU rows on v5e,
             256 on v6e/v7x).
    """
    assert block_b % 8 == 0
    (w_ih, w_hh, b_lstm, w1, b1, w2, b2, w3, b3) = kparams

    x = jnp.asarray(x, jnp.float32)
    if x.ndim == 1:
        x = x.reshape(1, -1)
    B, T = x.shape

    bb = min(block_b, pl.cdiv(B, 8) * 8)       # batch tile (multiple of 8 sublanes)
    num_blocks = pl.cdiv(B, bb)
    b_pad = num_blocks * bb
    if b_pad != B:
        x = jnp.pad(x, ((0, b_pad - B), (0, 0)))

    H, F1, F2, O = HIDDEN_LSTM, HIDDEN_FFN1, HIDDEN_FFN2, OUTPUT_DIM
    const = lambda shape: pl.BlockSpec(shape, lambda i: (0, 0))   # resident weights

    grid_spec = pltpu.PrefetchScalarGridSpec(
        num_scalar_prefetch=0,
        grid=(num_blocks,),
        in_specs=[
            pl.BlockSpec((bb, T), lambda i: (i, 0)),   # x
            const((1, 4 * H)),                         # w_ih
            const((H, 4 * H)),                         # w_hh
            const((1, 4 * H)),                         # b_lstm
            const((H, F1)),                            # w1
            const((1, F1)),                            # b1
            const((F1, F2)),                           # w2
            const((1, F2)),                            # b2
            const((F2, O)),                            # w3
            const((1, O)),                             # b3
        ],
        out_specs=pl.BlockSpec((bb, O), lambda i: (i, 0)),
    )

    out = pl.pallas_call(
        functools.partial(_policy_kernel, T),
        out_shape=jax.ShapeDtypeStruct((b_pad, O), jnp.float32),
        grid_spec=grid_spec,
        compiler_params=pltpu.CompilerParams(
            dimension_semantics=("parallel",)),        # v7x: shard blocks across 2 TCs
    )(x, w_ih, w_hh, b_lstm, w1, b1, w2, b2, w3, b3)

    return out[:B]


# ----------------------------------------------------------------------------
# Parameters (torch layout) and kernel-layout preparation
# ----------------------------------------------------------------------------

def init_torch_params(key):
    """Synthetic params in PyTorch layout, matching the module's init scheme."""
    H = HIDDEN_LSTM
    bound = 1.0 / (float(H) ** 0.5)
    ks = jax.random.split(key, 7)
    p = {
        # nn.LSTM default init: uniform(-1/sqrt(H), 1/sqrt(H)); gate order [i, f, g, o]
        "lstm_w_ih": jax.random.uniform(ks[0], (4 * H, 1), minval=-bound, maxval=bound),
        "lstm_w_hh": jax.random.uniform(ks[1], (4 * H, H), minval=-bound, maxval=bound),
        "lstm_b_ih": jax.random.uniform(ks[2], (4 * H,), minval=-bound, maxval=bound),
        "lstm_b_hh": jax.random.uniform(ks[3], (4 * H,), minval=-bound, maxval=bound),
        # init_weights: Linear weights ~ N(0, 0.1), biases = 0
        "w1": 0.1 * jax.random.normal(ks[4], (HIDDEN_FFN1, HIDDEN_LSTM)),
        "b1": jnp.zeros((HIDDEN_FFN1,)),
        "w2": 0.1 * jax.random.normal(ks[5], (HIDDEN_FFN2, HIDDEN_FFN1)),
        "b2": jnp.zeros((HIDDEN_FFN2,)),
        "w3": 0.1 * jax.random.normal(ks[6], (OUTPUT_DIM, HIDDEN_FFN2)),
        "b3": jnp.zeros((OUTPUT_DIM,)),
    }
    return {k: v.astype(jnp.float32) for k, v in p.items()}


def prepare_params(tp):
    """Torch layout -> kernel layout: transpose, combine biases, pre-scale the g-gate slice
    by 2 (single-sigmoid slab: tanh(g) = 2*sigmoid(2g)-1; the x2 is a power-of-two scale
    so it survives the bf16 cast exactly), bf16 matmul weights, f32 elementwise path."""
    H = HIDDEN_LSTM
    g = slice(2 * H, 3 * H)

    w_ih = tp["lstm_w_ih"].T                      # (1, 4H)
    w_ih = w_ih.at[:, g].multiply(2.0).astype(jnp.float32)

    w_hh = tp["lstm_w_hh"].T                      # (H, 4H)
    w_hh = w_hh.at[:, g].multiply(2.0).astype(jnp.bfloat16)

    b_lstm = (tp["lstm_b_ih"] + tp["lstm_b_hh"]).reshape(1, 4 * H)
    b_lstm = b_lstm.at[:, g].multiply(2.0).astype(jnp.float32)

    w1 = tp["w1"].T.astype(jnp.bfloat16)          # (128, 256)
    b1 = tp["b1"].reshape(1, -1).astype(jnp.float32)
    w2 = tp["w2"].T.astype(jnp.bfloat16)          # (256, 64)
    b2 = tp["b2"].reshape(1, -1).astype(jnp.float32)
    w3 = tp["w3"].T.astype(jnp.bfloat16)          # (64, 4)
    b3 = tp["b3"].reshape(1, -1).astype(jnp.float32)

    return (w_ih, w_hh, b_lstm, w1, b1, w2, b2, w3, b3)


# ----------------------------------------------------------------------------
# Pure-JAX reference (torch semantics, one state == one batch=1 sequence)
# ----------------------------------------------------------------------------

def policy_forward_ref(x, tp, matmul_dtype=None):
    """Pure-JAX reference. matmul_dtype=jnp.bfloat16 mirrors the kernel's mixed-precision
    matmuls; None is the full-f32 reference of the module."""
    H = HIDDEN_LSTM

    def mm(a, b):
        if matmul_dtype is not None:
            a = a.astype(matmul_dtype)
            b = b.astype(matmul_dtype)
        return jnp.dot(a, b, preferred_element_type=jnp.float32)

    x_flat = jnp.asarray(x, jnp.float32).reshape(-1)
    w_ih_row = tp["lstm_w_ih"].T                          # (1, 4H)
    w_hh_t = tp["lstm_w_hh"].T                            # (H, 4H)
    b = (tp["lstm_b_ih"] + tp["lstm_b_hh"]).reshape(1, 4 * H)

    def step(carry, x_t):
        h, c = carry
        gates = x_t * w_ih_row + mm(h, w_hh_t) + b
        i_g = jax.nn.sigmoid(gates[:, 0:H])
        f_g = jax.nn.sigmoid(gates[:, H:2 * H])
        g_g = jnp.tanh(gates[:, 2 * H:3 * H])
        o_g = jax.nn.sigmoid(gates[:, 3 * H:4 * H])
        c_new = f_g * c + i_g * g_g
        h_new = o_g * jnp.tanh(c_new)
        return (h_new, c_new), None

    init = (jnp.zeros((1, H), jnp.float32), jnp.zeros((1, H), jnp.float32))
    (h_last, _), _ = lax.scan(step, init, x_flat)

    z = _selu(mm(h_last, tp["w1"].T) + tp["b1"].reshape(1, -1))
    z = _selu(mm(z, tp["w2"].T) + tp["b2"].reshape(1, -1))
    return mm(z, tp["w3"].T) + tp["b3"].reshape(1, -1)


if __name__ == "__main__":
    key = jax.random.PRNGKey(0)
    k_params, k_x = jax.random.split(key)

    torch_params = init_torch_params(k_params)
    kernel_params = prepare_params(torch_params)

    # 16 independent states, each flattened by forward() to a sequence of 8 scalar steps.
    B, T = 16, 8
    x_batch = jax.random.normal(k_x, (B, T), dtype=jnp.float32)

    # block_b=8 so grid=(2,) exercises the batch grid (prod: 128 on v5e, 256 on v6e/v7x).
    out = policy_forward(x_batch, kernel_params, block_b=8)
    jax.block_until_ready(out)
    assert out.shape == (B, OUTPUT_DIM), out.shape

    # Per-row references (module semantics: each state is its own batch=1 sequence).
    ref_bf16 = jnp.concatenate(
        [policy_forward_ref(x_batch[b], torch_params, matmul_dtype=jnp.bfloat16)
         for b in range(B)], axis=0)
    ref_f32 = jnp.concatenate(
        [policy_forward_ref(x_batch[b], torch_params) for b in range(B)], axis=0)

    # Tight check vs. the reference that mirrors the kernel's bf16 matmuls.
    assert jnp.allclose(out, ref_bf16, rtol=1e-2, atol=1e-2), (out, ref_bf16)
    # Loose check vs. the full-f32 torch-semantics reference.
    assert jnp.allclose(out, ref_f32, rtol=5e-2, atol=5e-2), (out, ref_f32)

    # Single-state path — exactly the module's forward (x.view(1, -1, 1)).
    out1 = policy_forward(x_batch[0], kernel_params)
    jax.block_until_ready(out1)
    assert out1.shape == (1, OUTPUT_DIM), out1.shape
    assert jnp.allclose(out1, ref_f32[0:1], rtol=5e-2, atol=5e-2), (out1, ref_f32[0:1])

    print("KERNEL_OK")
</pallas_src>

<mosaic_0001>
module attributes {stable_mosaic.version = 11 : i64} {
  func.func @_policy_kernel(%arg0: i32, %arg1: memref<8x8xf32, #tpu.memory_space<vmem>>, %arg2: memref<1x512xf32, #tpu.memory_space<vmem>>, %arg3: memref<128x512xbf16, #tpu.memory_space<vmem>>, %arg4: memref<1x512xf32, #tpu.memory_space<vmem>>, %arg5: memref<128x256xbf16, #tpu.memory_space<vmem>>, %arg6: memref<1x256xf32, #tpu.memory_space<vmem>>, %arg7: memref<256x64xbf16, #tpu.memory_space<vmem>>, %arg8: memref<1x64xf32, #tpu.memory_space<vmem>>, %arg9: memref<64x4xbf16, #tpu.memory_space<vmem>>, %arg10: memref<1x4xf32, #tpu.memory_space<vmem>>, %arg11: memref<8x4xf32, #tpu.memory_space<vmem>>) attributes {dimension_semantics = [#tpu.dimension_semantics<parallel>], iteration_bounds = array<i64: 2>, scalar_prefetch = 0 : i64, scratch_operands = 0 : i64, tpu.core_type = #tpu.core_type<tc>, window_params = [{transform_indices = @transform_0, window_bounds = array<i64: 8, 8>}, {pipeline_mode = #tpu.pipeline_mode<synchronous>, transform_indices = @transform_1, window_bounds = array<i64: 1, 512>}, {pipeline_mode = #tpu.pipeline_mode<synchronous>, transform_indices = @transform_2, window_bounds = array<i64: 128, 512>}, {pipeline_mode = #tpu.pipeline_mode<synchronous>, transform_indices = @transform_3, window_bounds = array<i64: 1, 512>}, {pipeline_mode = #tpu.pipeline_mode<synchronous>, transform_indices = @transform_4, window_bounds = array<i64: 128, 256>}, {pipeline_mode = #tpu.pipeline_mode<synchronous>, transform_indices = @transform_5, window_bounds = array<i64: 1, 256>}, {pipeline_mode = #tpu.pipeline_mode<synchronous>, transform_indices = @transform_6, window_bounds = array<i64: 256, 64>}, {pipeline_mode = #tpu.pipeline_mode<synchronous>, transform_indices = @transform_7, window_bounds = array<i64: 1, 64>}, {pipeline_mode = #tpu.pipeline_mode<synchronous>, transform_indices = @transform_8, window_bounds = array<i64: 64, 4>}, {pipeline_mode = #tpu.pipeline_mode<synchronous>, transform_indices = @transform_9, window_bounds = array<i64: 1, 4>}, {transform_indices = @transform_10, window_bounds = array<i64: 8, 4>}]} {
    %c0 = arith.constant 0 : index
    %c0_0 = arith.constant 0 : index
    %0 = vector.load %arg2[%c0, %c0_0] : memref<1x512xf32, #tpu.memory_space<vmem>>, vector<1x512xf32>
    %c0_1 = arith.constant 0 : index
    %c0_2 = arith.constant 0 : index
    %1 = vector.load %arg4[%c0_1, %c0_2] : memref<1x512xf32, #tpu.memory_space<vmem>>, vector<1x512xf32>
    %cst = arith.constant 0.000000e+00 : f32
    %2 = vector.broadcast %cst : f32 to vector<8x128xf32>
    %cst_3 = arith.constant 0.000000e+00 : f32
    %3 = vector.broadcast %cst_3 : f32 to vector<8x128xf32>
    %c0_4 = arith.constant 0 : index
    %c0_5 = arith.constant 0 : index
    %4 = vector.load %arg1[%c0_4, %c0_5] : memref<8x8xf32, #tpu.memory_space<vmem>>, vector<8x1xf32>
    %5 = vector.broadcast %4 : vector<8x1xf32> to vector<8x512xf32>
    %6 = vector.broadcast %0 : vector<1x512xf32> to vector<8x512xf32>
    %7 = arith.mulf %5, %6 : vector<8x512xf32>
    %8 = vector.broadcast %1 : vector<1x512xf32> to vector<8x512xf32>
    %9 = arith.addf %7, %8 : vector<8x512xf32>
    %10 = arith.truncf %2 : vector<8x128xf32> to vector<8x128xbf16>
    %c0_6 = arith.constant 0 : index
    %c0_7 = arith.constant 0 : index
    %11 = vector.load %arg3[%c0_6, %c0_7] : memref<128x512xbf16, #tpu.memory_space<vmem>>, vector<128x512xbf16>
    %cst_8 = arith.constant dense<0.000000e+00> : vector<8x512xf32>
    %12 = tpu.matmul %10, %11, %cst_8 {dimension_numbers = #tpu.dot_dimension_numbers<[1], [0], [0], [1], [0, 0, 1, 1], [], []>} : vector<8x128xbf16>, vector<128x512xbf16>, vector<8x512xf32> -> vector<8x512xf32>
    %13 = arith.addf %9, %12 : vector<8x512xf32>
    %14 = arith.negf %13 : vector<8x512xf32>
    %15 = math.exp %14 : vector<8x512xf32>
    %cst_9 = arith.constant 1.000000e+00 : f32
    %16 = vector.broadcast %cst_9 : f32 to vector<8x512xf32>
    %17 = arith.addf %16, %15 : vector<8x512xf32>
    %18 = arith.divf %16, %17 : vector<8x512xf32>
    %19 = vector.extract_strided_slice %18 {offsets = [0, 0], sizes = [8, 128], strides = [1, 1]} : vector<8x512xf32> to vector<8x128xf32>
    %20 = vector.extract_strided_slice %18 {offsets = [0, 128], sizes = [8, 128], strides = [1, 1]} : vector<8x512xf32> to vector<8x128xf32>
    %21 = vector.extract_strided_slice %18 {offsets = [0, 256], sizes = [8, 128], strides = [1, 1]} : vector<8x512xf32> to vector<8x128xf32>
    %cst_10 = arith.constant 2.000000e+00 : f32
    %22 = vector.broadcast %cst_10 : f32 to vector<8x128xf32>
    %23 = arith.mulf %22, %21 : vector<8x128xf32>
    %cst_11 = arith.constant 1.000000e+00 : f32
    %24 = vector.broadcast %cst_11 : f32 to vector<8x128xf32>
    %25 = arith.subf %23, %24 : vector<8x128xf32>
    %26 = vector.extract_strided_slice %18 {offsets = [0, 384], sizes = [8, 128], strides = [1, 1]} : vector<8x512xf32> to vector<8x128xf32>
    %27 = arith.mulf %20, %3 : vector<8x128xf32>
    %28 = arith.mulf %19, %25 : vector<8x128xf32>
    %29 = arith.addf %27, %28 : vector<8x128xf32>
    %30 = math.tanh %29 : vector<8x128xf32>
    %31 = arith.mulf %26, %30 : vector<8x128xf32>
    %c0_12 = arith.constant 0 : index
    %c1 = arith.constant 1 : index
    %32 = vector.load %arg1[%c0_12, %c1] : memref<8x8xf32, #tpu.memory_space<vmem>>, vector<8x1xf32>
    %33 = vector.broadcast %32 : vector<8x1xf32> to vector<8x512xf32>
    %34 = vector.broadcast %0 : vector<1x512xf32> to vector<8x512xf32>
    %35 = arith.mulf %33, %34 : vector<8x512xf32>
    %36 = vector.broadcast %1 : vector<1x512xf32> to vector<8x512xf32>
    %37 = arith.addf %35, %36 : vector<8x512xf32>
    %38 = arith.truncf %31 : vector<8x128xf32> to vector<8x128xbf16>
    %c0_13 = arith.constant 0 : index
    %c0_14 = arith.constant 0 : index
    %39 = vector.load %arg3[%c0_13, %c0_14] : memref<128x512xbf16, #tpu.memory_space<vmem>>, vector<128x512xbf16>
    %cst_15 = arith.constant dense<0.000000e+00> : vector<8x512xf32>
    %40 = tpu.matmul %38, %39, %cst_15 {dimension_numbers = #tpu.dot_dimension_numbers<[1], [0], [0], [1], [0, 0, 1, 1], [], []>} : vector<8x128xbf16>, vector<128x512xbf16>, vector<8x512xf32> -> vector<8x512xf32>
    %41 = arith.addf %37, %40 : vector<8x512xf32>
    %42 = arith.negf %41 : vector<8x512xf32>
    %43 = math.exp %42 : vector<8x512xf32>
    %cst_16 = arith.constant 1.000000e+00 : f32
    %44 = vector.broadcast %cst_16 : f32 to vector<8x512xf32>
    %45 = arith.addf %44, %43 : vector<8x512xf32>
    %46 = arith.divf %44, %45 : vector<8x512xf32>
    %47 = vector.extract_strided_slice %46 {offsets = [0, 0], sizes = [8, 128], strides = [1, 1]} : vector<8x512xf32> to vector<8x128xf32>
    %48 = vector.extract_strided_slice %46 {offsets = [0, 128], sizes = [8, 128], strides = [1, 1]} : vector<8x512xf32> to vector<8x128xf32>
    %49 = vector.extract_strided_slice %46 {offsets = [0, 256], sizes = [8, 128], strides = [1, 1]} : vector<8x512xf32> to vector<8x128xf32>
    %cst_17 = arith.constant 2.000000e+00 : f32
    %50 = vector.broadcast %cst_17 : f32 to vector<8x128xf32>
    %51 = arith.mulf %50, %49 : vector<8x128xf32>
    %cst_18 = arith.constant 1.000000e+00 : f32
    %52 = vector.broadcast %cst_18 : f32 to vector<8x128xf32>
    %53 = arith.subf %51, %52 : vector<8x128xf32>
    %54 = vector.extract_strided_slice %46 {offsets = [0, 384], sizes = [8, 128], strides = [1, 1]} : vector<8x512xf32> to vector<8x128xf32>
    %55 = arith.mulf %48, %29 : vector<8x128xf32>
    %56 = arith.mulf %47, %53 : vector<8x128xf32>
    %57 = arith.addf %55, %56 : vector<8x128xf32>
    %58 = math.tanh %57 : vector<8x128xf32>
    %59 = arith.mulf %54, %58 : vector<8x128xf32>
    %c0_19 = arith.constant 0 : index
    %c2 = arith.constant 2 : index
    %60 = vector.load %arg1[%c0_19, %c2] : memref<8x8xf32, #tpu.memory_space<vmem>>, vector<8x1xf32>
    %61 = vector.broadcast %60 : vector<8x1xf32> to vector<8x512xf32>
    %62 = vector.broadcast %0 : vector<1x512xf32> to vector<8x512xf32>
    %63 = arith.mulf %61, %62 : vector<8x512xf32>
    %64 = vector.broadcast %1 : vector<1x512xf32> to vector<8x512xf32>
    %65 = arith.addf %63, %64 : vector<8x512xf32>
    %66 = arith.truncf %59 : vector<8x128xf32> to vector<8x128xbf16>
    %c0_20 = arith.constant 0 : index
    %c0_21 = arith.constant 0 : index
    %67 = vector.load %arg3[%c0_20, %c0_21] : memref<128x512xbf16, #tpu.memory_space<vmem>>, vector<128x512xbf16>
    %cst_22 = arith.constant dense<0.000000e+00> : vector<8x512xf32>
    %68 = tpu.matmul %66, %67, %cst_22 {dimension_numbers = #tpu.dot_dimension_numbers<[1], [0], [0], [1], [0, 0, 1, 1], [], []>} : vector<8x128xbf16>, vector<128x512xbf16>, vector<8x512xf32> -> vector<8x512xf32>
    %69 = arith.addf %65, %68 : vector<8x512xf32>
    %70 = arith.negf %69 : vector<8x512xf32>
    %71 = math.exp %70 : vector<8x512xf32>
    %cst_23 = arith.constant 1.000000e+00 : f32
    %72 = vector.broadcast %cst_23 : f32 to vector<8x512xf32>
    %73 = arith.addf %72, %71 : vector<8x512xf32>
    %74 = arith.divf %72, %73 : vector<8x512xf32>
    %75 = vector.extract_strided_slice %74 {offsets = [0, 0], sizes = [8, 128], strides = [1, 1]} : vector<8x512xf32> to vector<8x128xf32>
    %76 = vector.extract_strided_slice %74 {offsets = [0, 128], sizes = [8, 128], strides = [1, 1]} : vector<8x512xf32> to vector<8x128xf32>
    %77 = vector.extract_strided_slice %74 {offsets = [0, 256], sizes = [8, 128], strides = [1, 1]} : vector<8x512xf32> to vector<8x128xf32>
    %cst_24 = arith.constant 2.000000e+00 : f32
    %78 = vector.broadcast %cst_24 : f32 to vector<8x128xf32>
    %79 = arith.mulf %78, %77 : vector<8x128xf32>
    %cst_25 = arith.constant 1.000000e+00 : f32
    %80 = vector.broadcast %cst_25 : f32 to vector<8x128xf32>
    %81 = arith.subf %79, %80 : vector<8x128xf32>
    %82 = vector.extract_strided_slice %74 {offsets = [0, 384], sizes = [8, 128], strides = [1, 1]} : vector<8x512xf32> to vector<8x128xf32>
    %83 = arith.mulf %76, %57 : vector<8x128xf32>
    %84 = arith.mulf %75, %81 : vector<8x128xf32>
    %85 = arith.addf %83, %84 : vector<8x128xf32>
    %86 = math.tanh %85 : vector<8x128xf32>
    %87 = arith.mulf %82, %86 : vector<8x128xf32>
    %c0_26 = arith.constant 0 : index
    %c3 = arith.constant 3 : index
    %88 = vector.load %arg1[%c0_26, %c3] : memref<8x8xf32, #tpu.memory_space<vmem>>, vector<8x1xf32>
    %89 = vector.broadcast %88 : vector<8x1xf32> to vector<8x512xf32>
    %90 = vector.broadcast %0 : vector<1x512xf32> to vector<8x512xf32>
    %91 = arith.mulf %89, %90 : vector<8x512xf32>
    %92 = vector.broadcast %1 : vector<1x512xf32> to vector<8x512xf32>
    %93 = arith.addf %91, %92 : vector<8x512xf32>
    %94 = arith.truncf %87 : vector<8x128xf32> to vector<8x128xbf16>
    %c0_27 = arith.constant 0 : index
    %c0_28 = arith.constant 0 : index
    %95 = vector.load %arg3[%c0_27, %c0_28] : memref<128x512xbf16, #tpu.memory_space<vmem>>, vector<128x512xbf16>
    %cst_29 = arith.constant dense<0.000000e+00> : vector<8x512xf32>
    %96 = tpu.matmul %94, %95, %cst_29 {dimension_numbers = #tpu.dot_dimension_numbers<[1], [0], [0], [1], [0, 0, 1, 1], [], []>} : vector<8x128xbf16>, vector<128x512xbf16>, vector<8x512xf32> -> vector<8x512xf32>
    %97 = arith.addf %93, %96 : vector<8x512xf32>
    %98 = arith.negf %97 : vector<8x512xf32>
    %99 = math.exp %98 : vector<8x512xf32>
    %cst_30 = arith.constant 1.000000e+00 : f32
    %100 = vector.broadcast %cst_30 : f32 to vector<8x512xf32>
    %101 = arith.addf %100, %99 : vector<8x512xf32>
    %102 = arith.divf %100, %101 : vector<8x512xf32>
    %103 = vector.extract_strided_slice %102 {offsets = [0, 0], sizes = [8, 128], strides = [1, 1]} : vector<8x512xf32> to vector<8x128xf32>
    %104 = vector.extract_strided_slice %102 {offsets = [0, 128], sizes = [8, 128], strides = [1, 1]} : vector<8x512xf32> to vector<8x128xf32>
    %105 = vector.extract_strided_slice %102 {offsets = [0, 256], sizes = [8, 128], strides = [1, 1]} : vector<8x512xf32> to vector<8x128xf32>
    %cst_31 = arith.constant 2.000000e+00 : f32
    %106 = vector.broadcast %cst_31 : f32 to vector<8x128xf32>
    %107 = arith.mulf %106, %105 : vector<8x128xf32>
    %cst_32 = arith.constant 1.000000e+00 : f32
    %108 = vector.broadcast %cst_32 : f32 to vector<8x128xf32>
    %109 = arith.subf %107, %108 : vector<8x128xf32>
    %110 = vector.extract_strided_slice %102 {offsets = [0, 384], sizes = [8, 128], strides = [1, 1]} : vector<8x512xf32> to vector<8x128xf32>
    %111 = arith.mulf %104, %85 : vector<8x128xf32>
    %112 = arith.mulf %103, %109 : vector<8x128xf32>
    %113 = arith.addf %111, %112 : vector<8x128xf32>
    %114 = math.tanh %113 : vector<8x128xf32>
    %115 = arith.mulf %110, %114 : vector<8x128xf32>
    %c0_33 = arith.constant 0 : index
    %c4 = arith.constant 4 : index
    %116 = vector.load %arg1[%c0_33, %c4] : memref<8x8xf32, #tpu.memory_space<vmem>>, vector<8x1xf32>
    %117 = vector.broadcast %116 : vector<8x1xf32> to vector<8x512xf32>
    %118 = vector.broadcast %0 : vector<1x512xf32> to vector<8x512xf32>
    %119 = arith.mulf %117, %118 : vector<8x512xf32>
    %120 = vector.broadcast %1 : vector<1x512xf32> to vector<8x512xf32>
    %121 = arith.addf %119, %120 : vector<8x512xf32>
    %122 = arith.truncf %115 : vector<8x128xf32> to vector<8x128xbf16>
    %c0_34 = arith.constant 0 : index
    %c0_35 = arith.constant 0 : index
    %123 = vector.load %arg3[%c0_34, %c0_35] : memref<128x512xbf16, #tpu.memory_space<vmem>>, vector<128x512xbf16>
    %cst_36 = arith.constant dense<0.000000e+00> : vector<8x512xf32>
    %124 = tpu.matmul %122, %123, %cst_36 {dimension_numbers = #tpu.dot_dimension_numbers<[1], [0], [0], [1], [0, 0, 1, 1], [], []>} : vector<8x128xbf16>, vector<128x512xbf16>, vector<8x512xf32> -> vector<8x512xf32>
    %125 = arith.addf %121, %124 : vector<8x512xf32>
    %126 = arith.negf %125 : vector<8x512xf32>
    %127 = math.exp %126 : vector<8x512xf32>
    %cst_37 = arith.constant 1.000000e+00 : f32
    %128 = vector.broadcast %cst_37 : f32 to vector<8x512xf32>
    %129 = arith.addf %128, %127 : vector<8x512xf32>
    %130 = arith.divf %128, %129 : vector<8x512xf32>
    %131 = vector.extract_strided_slice %130 {offsets = [0, 0], sizes = [8, 128], strides = [1, 1]} : vector<8x512xf32> to vector<8x128xf32>
    %132 = vector.extract_strided_slice %130 {offsets = [0, 128], sizes = [8, 128], strides = [1, 1]} : vector<8x512xf32> to vector<8x128xf32>
    %133 = vector.extract_strided_slice %130 {offsets = [0, 256], sizes = [8, 128], strides = [1, 1]} : vector<8x512xf32> to vector<8x128xf32>
    %cst_38 = arith.constant 2.000000e+00 : f32
    %134 = vector.broadcast %cst_38 : f32 to vector<8x128xf32>
    %135 = arith.mulf %134, %133 : vector<8x128xf32>
    %cst_39 = arith.constant 1.000000e+00 : f32
    %136 = vector.broadcast %cst_39 : f32 to vector<8x128xf32>
    %137 = arith.subf %135, %136 : vector<8x128xf32>
    %138 = vector.extract_strided_slice %130 {offsets = [0, 384], sizes = [8, 128], strides = [1, 1]} : vector<8x512xf32> to vector<8x128xf32>
    %139 = arith.mulf %132, %113 : vector<8x128xf32>
    %140 = arith.mulf %131, %137 : vector<8x128xf32>
    %141 = arith.addf %139, %140 : vector<8x128xf32>
    %142 = math.tanh %141 : vector<8x128xf32>
    %143 = arith.mulf %138, %142 : vector<8x128xf32>
    %c0_40 = arith.constant 0 : index
    %c5 = arith.constant 5 : index
    %144 = vector.load %arg1[%c0_40, %c5] : memref<8x8xf32, #tpu.memory_space<vmem>>, vector<8x1xf32>
    %145 = vector.broadcast %144 : vector<8x1xf32> to vector<8x512xf32>
    %146 = vector.broadcast %0 : vector<1x512xf32> to vector<8x512xf32>
    %147 = arith.mulf %145, %146 : vector<8x512xf32>
    %148 = vector.broadcast %1 : vector<1x512xf32> to vector<8x512xf32>
    %149 = arith.addf %147, %148 : vector<8x512xf32>
    %150 = arith.truncf %143 : vector<8x128xf32> to vector<8x128xbf16>
    %c0_41 = arith.constant 0 : index
    %c0_42 = arith.constant 0 : index
    %151 = vector.load %arg3[%c0_41, %c0_42] : memref<128x512xbf16, #tpu.memory_space<vmem>>, vector<128x512xbf16>
    %cst_43 = arith.constant dense<0.000000e+00> : vector<8x512xf32>
    %152 = tpu.matmul %150, %151, %cst_43 {dimension_numbers = #tpu.dot_dimension_numbers<[1], [0], [0], [1], [0, 0, 1, 1], [], []>} : vector<8x128xbf16>, vector<128x512xbf16>, vector<8x512xf32> -> vector<8x512xf32>
    %153 = arith.addf %149, %152 : vector<8x512xf32>
    %154 = arith.negf %153 : vector<8x512xf32>
    %155 = math.exp %154 : vector<8x512xf32>
    %cst_44 = arith.constant 1.000000e+00 : f32
    %156 = vector.broadcast %cst_44 : f32 to vector<8x512xf32>
    %157 = arith.addf %156, %155 : vector<8x512xf32>
    %158 = arith.divf %156, %157 : vector<8x512xf32>
    %159 = vector.extract_strided_slice %158 {offsets = [0, 0], sizes = [8, 128], strides = [1, 1]} : vector<8x512xf32> to vector<8x128xf32>
    %160 = vector.extract_strided_slice %158 {offsets = [0, 128], sizes = [8, 128], strides = [1, 1]} : vector<8x512xf32> to vector<8x128xf32>
    %161 = vector.extract_strided_slice %158 {offsets = [0, 256], sizes = [8, 128], strides = [1, 1]} : vector<8x512xf32> to vector<8x128xf32>
    %cst_45 = arith.constant 2.000000e+00 : f32
    %162 = vector.broadcast %cst_45 : f32 to vector<8x128xf32>
    %163 = arith.mulf %162, %161 : vector<8x128xf32>
    %cst_46 = arith.constant 1.000000e+00 : f32
    %164 = vector.broadcast %cst_46 : f32 to vector<8x128xf32>
    %165 = arith.subf %163, %164 : vector<8x128xf32>
    %166 = vector.extract_strided_slice %158 {offsets = [0, 384], sizes = [8, 128], strides = [1, 1]} : vector<8x512xf32> to vector<8x128xf32>
    %167 = arith.mulf %160, %141 : vector<8x128xf32>
    %168 = arith.mulf %159, %165 : vector<8x128xf32>
    %169 = arith.addf %167, %168 : vector<8x128xf32>
    %170 = math.tanh %169 : vector<8x128xf32>
    %171 = arith.mulf %166, %170 : vector<8x128xf32>
    %c0_47 = arith.constant 0 : index
    %c6 = arith.constant 6 : index
    %172 = vector.load %arg1[%c0_47, %c6] : memref<8x8xf32, #tpu.memory_space<vmem>>, vector<8x1xf32>
    %173 = vector.broadcast %172 : vector<8x1xf32> to vector<8x512xf32>
    %174 = vector.broadcast %0 : vector<1x512xf32> to vector<8x512xf32>
    %175 = arith.mulf %173, %174 : vector<8x512xf32>
    %176 = vector.broadcast %1 : vector<1x512xf32> to vector<8x512xf32>
    %177 = arith.addf %175, %176 : vector<8x512xf32>
    %178 = arith.truncf %171 : vector<8x128xf32> to vector<8x128xbf16>
    %c0_48 = arith.constant 0 : index
    %c0_49 = arith.constant 0 : index
    %179 = vector.load %arg3[%c0_48, %c0_49] : memref<128x512xbf16, #tpu.memory_space<vmem>>, vector<128x512xbf16>
    %cst_50 = arith.constant dense<0.000000e+00> : vector<8x512xf32>
    %180 = tpu.matmul %178, %179, %cst_50 {dimension_numbers = #tpu.dot_dimension_numbers<[1], [0], [0], [1], [0, 0, 1, 1], [], []>} : vector<8x128xbf16>, vector<128x512xbf16>, vector<8x512xf32> -> vector<8x512xf32>
    %181 = arith.addf %177, %180 : vector<8x512xf32>
    %182 = arith.negf %181 : vector<8x512xf32>
    %183 = math.exp %182 : vector<8x512xf32>
    %cst_51 = arith.constant 1.000000e+00 : f32
    %184 = vector.broadcast %cst_51 : f32 to vector<8x512xf32>
    %185 = arith.addf %184, %183 : vector<8x512xf32>
    %186 = arith.divf %184, %185 : vector<8x512xf32>
    %187 = vector.extract_strided_slice %186 {offsets = [0, 0], sizes = [8, 128], strides = [1, 1]} : vector<8x512xf32> to vector<8x128xf32>
    %188 = vector.extract_strided_slice %186 {offsets = [0, 128], sizes = [8, 128], strides = [1, 1]} : vector<8x512xf32> to vector<8x128xf32>
    %189 = vector.extract_strided_slice %186 {offsets = [0, 256], sizes = [8, 128], strides = [1, 1]} : vector<8x512xf32> to vector<8x128xf32>
    %cst_52 = arith.constant 2.000000e+00 : f32
    %190 = vector.broadcast %cst_52 : f32 to vector<8x128xf32>
    %191 = arith.mulf %190, %189 : vector<8x128xf32>
    %cst_53 = arith.constant 1.000000e+00 : f32
    %192 = vector.broadcast %cst_53 : f32 to vector<8x128xf32>
    %193 = arith.subf %191, %192 : vector<8x128xf32>
    %194 = vector.extract_strided_slice %186 {offsets = [0, 384], sizes = [8, 128], strides = [1, 1]} : vector<8x512xf32> to vector<8x128xf32>
    %195 = arith.mulf %188, %169 : vector<8x128xf32>
    %196 = arith.mulf %187, %193 : vector<8x128xf32>
    %197 = arith.addf %195, %196 : vector<8x128xf32>
    %198 = math.tanh %197 : vector<8x128xf32>
    %199 = arith.mulf %194, %198 : vector<8x128xf32>
    %c0_54 = arith.constant 0 : index
    %c7 = arith.constant 7 : index
    %200 = vector.load %arg1[%c0_54, %c7] : memref<8x8xf32, #tpu.memory_space<vmem>>, vector<8x1xf32>
    %201 = vector.broadcast %200 : vector<8x1xf32> to vector<8x512xf32>
    %202 = vector.broadcast %0 : vector<1x512xf32> to vector<8x512xf32>
    %203 = arith.mulf %201, %202 : vector<8x512xf32>
    %204 = vector.broadcast %1 : vector<1x512xf32> to vector<8x512xf32>
    %205 = arith.addf %203, %204 : vector<8x512xf32>
    %206 = arith.truncf %199 : vector<8x128xf32> to vector<8x128xbf16>
    %c0_55 = arith.constant 0 : index
    %c0_56 = arith.constant 0 : index
    %207 = vector.load %arg3[%c0_55, %c0_56] : memref<128x512xbf16, #tpu.memory_space<vmem>>, vector<128x512xbf16>
    %cst_57 = arith.constant dense<0.000000e+00> : vector<8x512xf32>
    %208 = tpu.matmul %206, %207, %cst_57 {dimension_numbers = #tpu.dot_dimension_numbers<[1], [0], [0], [1], [0, 0, 1, 1], [], []>} : vector<8x128xbf16>, vector<128x512xbf16>, vector<8x512xf32> -> vector<8x512xf32>
    %209 = arith.addf %205, %208 : vector<8x512xf32>
    %210 = arith.negf %209 : vector<8x512xf32>
    %211 = math.exp %210 : vector<8x512xf32>
    %cst_58 = arith.constant 1.000000e+00 : f32
    %212 = vector.broadcast %cst_58 : f32 to vector<8x512xf32>
    %213 = arith.addf %212, %211 : vector<8x512xf32>
    %214 = arith.divf %212, %213 : vector<8x512xf32>
    %215 = vector.extract_strided_slice %214 {offsets = [0, 0], sizes = [8, 128], strides = [1, 1]} : vector<8x512xf32> to vector<8x128xf32>
    %216 = vector.extract_strided_slice %214 {offsets = [0, 128], sizes = [8, 128], strides = [1, 1]} : vector<8x512xf32> to vector<8x128xf32>
    %217 = vector.extract_strided_slice %214 {offsets = [0, 256], sizes = [8, 128], strides = [1, 1]} : vector<8x512xf32> to vector<8x128xf32>
    %cst_59 = arith.constant 2.000000e+00 : f32
    %218 = vector.broadcast %cst_59 : f32 to vector<8x128xf32>
    %219 = arith.mulf %218, %217 : vector<8x128xf32>
    %cst_60 = arith.constant 1.000000e+00 : f32
    %220 = vector.broadcast %cst_60 : f32 to vector<8x128xf32>
    %221 = arith.subf %219, %220 : vector<8x128xf32>
    %222 = vector.extract_strided_slice %214 {offsets = [0, 384], sizes = [8, 128], strides = [1, 1]} : vector<8x512xf32> to vector<8x128xf32>
    %223 = arith.mulf %216, %197 : vector<8x128xf32>
    %224 = arith.mulf %215, %221 : vector<8x128xf32>
    %225 = arith.addf %223, %224 : vector<8x128xf32>
    %226 = math.tanh %225 : vector<8x128xf32>
    %227 = arith.mulf %222, %226 : vector<8x128xf32>
    %228 = arith.truncf %227 : vector<8x128xf32> to vector<8x128xbf16>
    %c0_61 = arith.constant 0 : index
    %c0_62 = arith.constant 0 : index
    %229 = vector.load %arg5[%c0_61, %c0_62] : memref<128x256xbf16, #tpu.memory_space<vmem>>, vector<128x256xbf16>
    %cst_63 = arith.constant dense<0.000000e+00> : vector<8x256xf32>
    %230 = tpu.matmul %228, %229, %cst_63 {dimension_numbers = #tpu.dot_dimension_numbers<[1], [0], [0], [1], [0, 0, 1, 1], [], []>} : vector<8x128xbf16>, vector<128x256xbf16>, vector<8x256xf32> -> vector<8x256xf32>
    %c0_64 = arith.constant 0 : index
    %c0_65 = arith.constant 0 : index
    %231 = vector.load %arg6[%c0_64, %c0_65] : memref<1x256xf32, #tpu.memory_space<vmem>>, vector<1x256xf32>
    %232 = vector.broadcast %231 : vector<1x256xf32> to vector<8x256xf32>
    %233 = arith.addf %230, %232 : vector<8x256xf32>
    %cst_66 = arith.constant 0.000000e+00 : f32
    %234 = vector.broadcast %cst_66 : f32 to vector<8x256xf32>
    %235 = arith.cmpf ogt, %233, %234 : vector<8x256xf32>
    %cst_67 = arith.constant 0.000000e+00 : f32
    %236 = vector.broadcast %cst_67 : f32 to vector<8x256xf32>
    %237 = arith.minimumf %233, %236 : vector<8x256xf32>
    %238 = math.exp %237 : vector<8x256xf32>
    %cst_68 = arith.constant 1.000000e+00 : f32
    %239 = vector.broadcast %cst_68 : f32 to vector<8x256xf32>
    %240 = arith.subf %238, %239 : vector<8x256xf32>
    %cst_69 = arith.constant 1.67326319 : f32
    %241 = vector.broadcast %cst_69 : f32 to vector<8x256xf32>
    %242 = arith.mulf %241, %240 : vector<8x256xf32>
    %243 = arith.select %235, %233, %242 : vector<8x256xi1>, vector<8x256xf32>
    %cst_70 = arith.constant 1.05070102 : f32
    %244 = vector.broadcast %cst_70 : f32 to vector<8x256xf32>
    %245 = arith.mulf %244, %243 : vector<8x256xf32>
    %246 = arith.truncf %245 : vector<8x256xf32> to vector<8x256xbf16>
    %c0_71 = arith.constant 0 : index
    %c0_72 = arith.constant 0 : index
    %247 = vector.load %arg7[%c0_71, %c0_72] : memref<256x64xbf16, #tpu.memory_space<vmem>>, vector<256x64xbf16>
    %cst_73 = arith.constant dense<0.000000e+00> : vector<8x64xf32>
    %248 = tpu.matmul %246, %247, %cst_73 {dimension_numbers = #tpu.dot_dimension_numbers<[1], [0], [0], [1], [0, 0, 1, 1], [], []>} : vector<8x256xbf16>, vector<256x64xbf16>, vector<8x64xf32> -> vector<8x64xf32>
    %c0_74 = arith.constant 0 : index
    %c0_75 = arith.constant 0 : index
    %249 = vector.load %arg8[%c0_74, %c0_75] : memref<1x64xf32, #tpu.memory_space<vmem>>, vector<1x64xf32>
    %250 = vector.broadcast %249 : vector<1x64xf32> to vector<8x64xf32>
    %251 = arith.addf %248, %250 : vector<8x64xf32>
    %cst_76 = arith.constant 0.000000e+00 : f32
    %252 = vector.broadcast %cst_76 : f32 to vector<8x64xf32>
    %253 = arith.cmpf ogt, %251, %252 : vector<8x64xf32>
    %cst_77 = arith.constant 0.000000e+00 : f32
    %254 = vector.broadcast %cst_77 : f32 to vector<8x64xf32>
    %255 = arith.minimumf %251, %254 : vector<8x64xf32>
    %256 = math.exp %255 : vector<8x64xf32>
    %cst_78 = arith.constant 1.000000e+00 : f32
    %257 = vector.broadcast %cst_78 : f32 to vector<8x64xf32>
    %258 = arith.subf %256, %257 : vector<8x64xf32>
    %cst_79 = arith.constant 1.67326319 : f32
    %259 = vector.broadcast %cst_79 : f32 to vector<8x64xf32>
    %260 = arith.mulf %259, %258 : vector<8x64xf32>
    %261 = arith.select %253, %251, %260 : vector<8x64xi1>, vector<8x64xf32>
    %cst_80 = arith.constant 1.05070102 : f32
    %262 = vector.broadcast %cst_80 : f32 to vector<8x64xf32>
    %263 = arith.mulf %262, %261 : vector<8x64xf32>
    %264 = arith.truncf %263 : vector<8x64xf32> to vector<8x64xbf16>
    %c0_81 = arith.constant 0 : index
    %c0_82 = arith.constant 0 : index
    %265 = vector.load %arg9[%c0_81, %c0_82] : memref<64x4xbf16, #tpu.memory_space<vmem>>, vector<64x4xbf16>
    %cst_83 = arith.constant dense<0.000000e+00> : vector<8x4xf32>
    %266 = tpu.matmul %264, %265, %cst_83 {dimension_numbers = #tpu.dot_dimension_numbers<[1], [0], [0], [1], [0, 0, 1, 1], [], []>} : vector<8x64xbf16>, vector<64x4xbf16>, vector<8x4xf32> -> vector<8x4xf32>
    %c0_84 = arith.constant 0 : index
    %c0_85 = arith.constant 0 : index
    %267 = vector.load %arg10[%c0_84, %c0_85] : memref<1x4xf32, #tpu.memory_space<vmem>>, vector<1x4xf32>
    %268 = vector.broadcast %267 : vector<1x4xf32> to vector<8x4xf32>
    %269 = arith.addf %266, %268 : vector<8x4xf32>
    %c0_86 = arith.constant 0 : index
    %c0_87 = arith.constant 0 : index
    %270 = vector.load %arg11[%c0_86, %c0_87] : memref<8x4xf32, #tpu.memory_space<vmem>>, vector<8x4xf32>
    tpu.vector_store %arg11[%c0_86, %c0_87], %269 {strides = array<i32>} : memref<8x4xf32, #tpu.memory_space<vmem>>, vector<8x4xf32>,
    return
  }
  func.func @transform_0(%arg0: i32) -> (i32, i32) {
    %c0_i32 = arith.constant 0 : i32
    %c0_i32_0 = arith.constant 0 : i32
    return %arg0, %c0_i32 : i32, i32
  }
  func.func @transform_1(%arg0: i32) -> (i32, i32) {
    %c0_i32 = arith.constant 0 : i32
    %c0_i32_0 = arith.constant 0 : i32
    %c0_i32_1 = arith.constant 0 : i32
    return %c0_i32, %c0_i32_0 : i32, i32
  }
  func.func @transform_2(%arg0: i32) -> (i32, i32) {
    %c0_i32 = arith.constant 0 : i32
    %c0_i32_0 = arith.constant 0 : i32
    %c0_i32_1 = arith.constant 0 : i32
    return %c0_i32, %c0_i32_0 : i32, i32
  }
  func.func @transform_3(%arg0: i32) -> (i32, i32) {
    %c0_i32 = arith.constant 0 : i32
    %c0_i32_0 = arith.constant 0 : i32
    %c0_i32_1 = arith.constant 0 : i32
    return %c0_i32, %c0_i32_0 : i32, i32
  }
  func.func @transform_4(%arg0: i32) -> (i32, i32) {
    %c0_i32 = arith.constant 0 : i32
    %c0_i32_0 = arith.constant 0 : i32
    %c0_i32_1 = arith.constant 0 : i32
    return %c0_i32, %c0_i32_0 : i32, i32
  }
  func.func @transform_5(%arg0: i32) -> (i32, i32) {
    %c0_i32 = arith.constant 0 : i32
    %c0_i32_0 = arith.constant 0 : i32
    %c0_i32_1 = arith.constant 0 : i32
    return %c0_i32, %c0_i32_0 : i32, i32
  }
  func.func @transform_6(%arg0: i32) -> (i32, i32) {
    %c0_i32 = arith.constant 0 : i32
    %c0_i32_0 = arith.constant 0 : i32
    %c0_i32_1 = arith.constant 0 : i32
    return %c0_i32, %c0_i32_0 : i32, i32
  }
  func.func @transform_7(%arg0: i32) -> (i32, i32) {
    %c0_i32 = arith.constant 0 : i32
    %c0_i32_0 = arith.constant 0 : i32
    %c0_i32_1 = arith.constant 0 : i32
    return %c0_i32, %c0_i32_0 : i32, i32
  }
  func.func @transform_8(%arg0: i32) -> (i32, i32) {
    %c0_i32 = arith.constant 0 : i32
    %c0_i32_0 = arith.constant 0 : i32
    %c0_i32_1 = arith.constant 0 : i32
    return %c0_i32, %c0_i32_0 : i32, i32
  }
  func.func @transform_9(%arg0: i32) -> (i32, i32) {
    %c0_i32 = arith.constant 0 : i32
    %c0_i32_0 = arith.constant 0 : i32
    %c0_i32_1 = arith.constant 0 : i32
    return %c0_i32, %c0_i32_0 : i32, i32
  }
  func.func @transform_10(%arg0: i32) -> (i32, i32) {
    %c0_i32 = arith.constant 0 : i32
    %c0_i32_0 = arith.constant 0 : i32
    return %arg0, %c0_i32 : i32, i32
  }
}

</mosaic_0001>

<bundles_post_ra>
// kernel: tpu_custom_call.1
= control target key start
LH: loop header
LB: loop body
LE: loop exit
PB: predicated region body
PF: predicated region fallthrough
CT: control target
= control target key end

     0   :  { %15 = vsyncpa [#allocation3], 0  ;;  %s3707_s0 = inlined_call_operand.vmem [shape: f32[16,8], index: 0, kind: input, shape index: {}]   ;;  %s3708_s1 = inlined_call_operand.hbm [shape: f32[1,512], index: 1, kind: input, shape index: {}]   ;;  %s3709_s2 = inlined_call_operand.vmem [shape: bf16[128,512], index: 2, kind: input, shape index: {}]   ;;  %s3710_s3 = inlined_call_operand.vmem [shape: f32[1,512], index: 3, kind: input, shape index: {}]   ;;  %s3711_s4 = inlined_call_operand.hbm [shape: bf16[128,256], index: 4, kind: input, shape index: {}]   ;;  %s3712_s5 = inlined_call_operand.vmem [shape: f32[1,256], index: 5, kind: input, shape index: {}]   ;;  %s3713_s6 = inlined_call_operand.vmem [shape: bf16[256,64], index: 6, kind: input, shape index: {}]   ;;  %s3714_s7 = inlined_call_operand.vmem [shape: f32[1,64], index: 7, kind: input, shape index: {}]   ;;  %s3715_s8 = inlined_call_operand.vmem [shape: bf16[64,4], index: 8, kind: input, shape index: {}]   ;;  %s3716_s9 = inlined_call_operand.vmem [shape: f32[1,4], index: 9, kind: input, shape index: {}]   ;;  %s3717_s10 = inlined_call_operand.vmem [shape: f32[16,4], index: 10, kind: output, shape index: {}]  }
   0x1   :  { %16 = vsyncpa [#allocation5], 0  ;;  %s2805_s13 = smov 0  }
   0x2 LB: > { %s2811_s14 = sadd.s32 4294967295, %s2734_s13   ;;  %p2175_p0 = scmp.ge.s32.totalorder %s2734_s13, 1  ;;  %s2734_s13 = sphi %s2805_s13, %s22_s13  }
   0x3   : > { %p268_p1 = scmp.lt.s32.totalorder %s2734_s13, 3  ;;  %p3718_p2 = scmp.eq.s32.totalorder %s2811_s14, 0 }
   0x4   : > { %s2736_s15 = smov [#allocation2]   ;;  %s2737_s18 = smov [#allocation4]  }
   0x5   : > { %s281_s16 = sshll.u32 %s2736_s15, 4  ;;  %p2816_p3 = pnand %p2175_p0, %p268_p1  ;;  %s282_s16 = int_to_ptr.vmem [resolvable:$true] %s281_s16 }
   0x6   : > { %s297_s19 = sshll.u32 %s2737_s18, 4  ;;  %s2664_s23 = scalar_lea.hbm %s3708_s1, 64  ;;  %s2828_s19 = int_to_ptr.vmem [resolvable:$true] %s297_s19 }
   0x7   : > { %s3724_s17 = scalar_select %p2816_p3, 1, 0 }
   0x8   : > { %p2347_p4 = pneg %p2816_p3  ;;  %p2665_p6 = scmp.ne.s32.totalorder %s3708_s1, %s2664_s23 }
   0x9   : > { %p2671_p10 = scmp.lt.u32.totalorder %s2664_s23, %s3708_s1 }
   0xa   : > { %p2824_p5 = pnand %p3718_p2, %p2347_p4 }
   0xc   : > { %p2666_p7 = pneg %p2824_p5 }
   0xe   : > { %p2667_p8 = pnand %p2666_p7, %p2665_p6 }
  0x10   : > { %p2668_p9 = pneg %p2667_p8 }
  0x12   : > { %p2673_p11 = pnand %p2671_p10, %p2668_p9 }
  0x14   : > { %2676 = shalt.err (!%p2673_p11)
}
  0x15   : > { %s2677_s28 = scalar_lea.vmem %s282_s16, 64  ;;  %p2685_p1 = scmp.lt.s32.totalorder %s282_s16, %s282_s16 }
  0x16   : > { %p2678_p12 = scmp.ne.s32.totalorder %s282_s16, %s2677_s28  ;;  %p2686_p4 = scmp.lt.s32.totalorder %s2677_s28, %s2677_s28 }
  0x18   : > { %p2680_p13 = pnand %p2678_p12, %p2666_p7  ;;  %p2687_p2 = por %p2686_p4, %p2685_p1 }
  0x1a   : > { %p2681_p0 = pneg %p2680_p13 }
  0x1c   : > { %p2688_p3 = pnand %p2687_p2, %p2681_p0 }
  0x1e   : > { %2691 = shalt.err (!%p2688_p3)
}
  0x1f   : > { %2350 = dma.hbm_to_vmem [thread:$0]  (!%p2824_p5), %s3708_s1, 64, %s282_s16, [#allocation3]  }
  0x20   : > { %s2692_s15 = scalar_lea.hbm %s3711_s4, 2048 }
  0x21   : > { %p2693_p6 = scmp.ne.s32.totalorder %s3711_s4, %s2692_s15  ;;  %p2699_p3 = scmp.lt.u32.totalorder %s2692_s15, %s3711_s4 }
  0x23   : > { %p2695_p8 = pnand %p2693_p6, %p2666_p7 }
  0x25   : > { %p2696_p2 = pneg %p2695_p8 }
  0x27   : > { %p2701_p9 = pnand %p2699_p3, %p2696_p2 }
  0x29   : > { %2704 = shalt.err (!%p2701_p9)
}
  0x2a   : > { %s2705_s16 = scalar_lea.vmem %s2828_s19, 2048  ;;  %p2713_p13 = scmp.lt.s32.totalorder %s2828_s19, %s2828_s19 }
  0x2b   : > { %p2706_p10 = scmp.ne.s32.totalorder %s2828_s19, %s2705_s16  ;;  %p2714_p0 = scmp.lt.s32.totalorder %s2705_s16, %s2705_s16 }
  0x2d   : > { %p2708_p11 = pnand %p2706_p10, %p2666_p7  ;;  %p2715_p1 = por %p2714_p0, %p2713_p13 }
  0x2f   : > { %p2709_p12 = pneg %p2708_p11 }
  0x31   : > { %p2716_p4 = pnand %p2715_p1, %p2709_p12 }
  0x33   : > { %2719 = shalt.err (!%p2716_p4)
}
  0x34   : > { %s2738_s24 = smov 128   ;;  %s2739_s25 = smov 8  }
  0x35   : > { %2353 = dma.hbm_to_vmem [thread:$0]  (!%p2824_p5), %s3711_s4, 2048, %s2828_s19, [#allocation5], %s2738_s24, %s2738_s24, %s2739_s25  }
  0x36   : > { %p3726_p6 = scmp.ne.s32.totalorder %s3724_s17, 0 }
  0x38   : > { %335 = sbr.rel (%p3726_p6) target bundleno = 2911 (0xb5f), region = 60 }
  0x3f   : > { %p3727_p7 = scmp.eq.s32.totalorder %s2811_s14, 0 }
  0x41   : > { %2725 = dma.done.wait (%p3727_p7), [#allocation3], 64   ;;  %p3728_p8 = pmov %p3727_p7 }
  0x42   : > { %p3729_p2 = pmov %p3727_p7 }
  0x43   : > { %2727 = vsyncadd (%p3728_p8), [#allocation3], 4294967232 }
  0x44   : > { %2729 = dma.done.wait (%p3729_p2), [#allocation5], 2048   ;;  %p3730_p3 = pmov %p3729_p2 }
  0x45   : > { %v3720_v0 = vmov 0   ;;  %v2893_v1 = vld [vmem:[%s3709_s2 + $0x4] ss:$16 sps:$4 sm:$0xff]   ;;  %v2898_v2 = vld [vmem:[%s3709_s2 + $0xc] ss:$16 sps:$4 sm:$0xff]   ;;  %p375_p5 = scmp.lt.s32.totalorder %s2811_s14, 1  ;;  %v393_v35 = vlaneseq }
  0x46   : > { %2731 = vsyncadd (%p3730_p3), [#allocation5], 4294965248  ;;  %666 = vmatprep.mubr.bf16.mxu0 %v3720_v0  ;;  %707 = vmatprep.mubr.bf16.mxu1 %v3720_v0  ;;  %v2904_v3 = vld [vmem:[%s3709_s2] ss:$16 sps:$4 sm:$0xff]   ;;  %v2909_v4 = vld [vmem:[%s3709_s2 + $0x8] ss:$16 sps:$4 sm:$0xff]  }
  0x47   : > { %2380 = vset.pattern.permute.xlu0 %v3720_v0  ;;  %634 = vmatprep.subr.bf16.mxu0 %v2893_v1  ;;  %v2915_v5 = vld [vmem:[%s3709_s2 + $0x24] ss:$16 sps:$4 sm:$0xff]   ;;  %v2922_v6 = vld [vmem:[%s3709_s2 + $0x2c] ss:$16 sps:$4 sm:$0xff]   ;;  %v2927_v7 = vld [vmem:[%s3709_s2 + $0x20] ss:$16 sps:$4 sm:$0xff]  }
  0x48   : > { %675 = vmatprep.subr.bf16.mxu1 %v2898_v2  ;;  %635 = vmatpush1.bf16.msra.mxu0 %v2904_v3  ;;  %v2933_v8 = vld [vmem:[%s3709_s2 + $0x28] ss:$16 sps:$4 sm:$0xff]   ;;  %v2939_v9 = vld [vmem:[%s3709_s2 + $0x44] ss:$16 sps:$4 sm:$0xff]   ;;  %v2945_v10 = vld [vmem:[%s3709_s2 + $0x4c] ss:$16 sps:$4 sm:$0xff]  }
  0x49   : > { %676 = vmatpush1.bf16.msra.mxu1 %v2909_v4  ;;  %636 = vmatprep.subr.bf16.mxu0 %v2915_v5  ;;  %v2950_v11 = vld [vmem:[%s3709_s2 + $0x40] ss:$16 sps:$4 sm:$0xff]   ;;  %v2955_v12 = vld [vmem:[%s3709_s2 + $0x48] ss:$16 sps:$4 sm:$0xff]   ;;  %v2962_v13 = vld [vmem:[%s3709_s2 + $0x64] ss:$16 sps:$4 sm:$0xff]  }
  0x4a   : > { %677 = vmatprep.subr.bf16.mxu1 %v2922_v6  ;;  %v2969_v14 = vld [vmem:[%s3709_s2 + $0x6c] ss:$16 sps:$4 sm:$0xff]   ;;  %v2974_v15 = vld [vmem:[%s3709_s2 + $0x60] ss:$16 sps:$4 sm:$0xff]   ;;  %s3737_s14 = smov (!%p375_p5, %s2811_s14), 1  ;;  %v2741_v34 = vmov 1  }
  0x4b   : > { %v2984_v16 = vld [vmem:[%s3709_s2 + $0x68] ss:$16 sps:$4 sm:$0xff]   ;;  %v2989_v17 = vld [vmem:[%s3709_s2 + $0x84] ss:$16 sps:$4 sm:$0xff]   ;;  %v2996_v18 = vld [vmem:[%s3709_s2 + $0x8c] ss:$16 sps:$4 sm:$0xff]  }
  0x4c   : > { %637 = vmatpush1.bf16.msra.mxu0 %v2927_v7  ;;  %v3001_v19 = vld [vmem:[%s3709_s2 + $0x80] ss:$16 sps:$4 sm:$0xff]   ;;  %v3006_v20 = vld [vmem:[%s3709_s2 + $0x88] ss:$16 sps:$4 sm:$0xff]   ;;  %s2182_s29 = sshll.u32 %s3737_s14, 3  ;;  %v394_v36 = vshrl.u32 %v393_v35, 7 }
  0x4d   : > { %678 = vmatpush1.bf16.msra.mxu1 %v2933_v8  ;;  %638 = vmatprep.subr.bf16.mxu0 %v2939_v9  ;;  %v3014_v21 = vld [vmem:[%s3709_s2 + $0xa4] ss:$16 sps:$4 sm:$0xff]   ;;  %v3021_v22 = vld [vmem:[%s3709_s2 + $0xac] ss:$16 sps:$4 sm:$0xff]   ;;  %s3028_s22 = scalar_lea.vmem %s3707_s0, %s2182_s29  ;;  %v3035_v23 = vld [vmem:[%s3709_s2 + $0xa0] ss:$16 sps:$4 sm:$0xff]   ;;  %s382_s25 = scalar_lea.vmem %s3717_s10, %s2182_s29 }
  0x4e   : > { %679 = vmatprep.subr.bf16.mxu1 %v2945_v10  ;;  %v3040_v24 = vld [vmem:[%s3709_s2 + $0xa8] ss:$16 sps:$4 sm:$0xff]   ;;  %v3047_v25 = vld [vmem:[%s3709_s2 + $0xc4] ss:$16 sps:$4 sm:$0xff]   ;;  %v3052_v26 = vld [vmem:[%s3709_s2 + $0xcc] ss:$16 sps:$4 sm:$0xff]  }
  0x4f   : > { %v3055_v27 = vld [vmem:[%s3028_s22] sm:$0xff]  ;;  %v3065_v29 = vld [vmem:[%s3709_s2 + $0xc8] ss:$16 sps:$4 sm:$0xff]   ;;  %v3076_v31 = vld [vmem:[%s3709_s2 + $0xec] ss:$16 sps:$4 sm:$0xff]   ;;  %v3137_v37 = vsub.s32 0, %v394_v36 }
  0x50   : > { %639 = vmatpush1.bf16.msra.mxu0 %v2950_v11  ;;  %v3060_v28 = vld [vmem:[%s3709_s2 + $0xc0] ss:$16 sps:$4 sm:$0xff]   ;;  %389 = vperm.xlu0 %2380, %v3055_v27   ;;  %v3071_v30 = vld [vmem:[%s3709_s2 + $0xe4] ss:$16 sps:$4 sm:$0xff]   ;;  %v3090_v33 = vld [vmem:[%s3709_s2 + $0xe8] ss:$16 sps:$4 sm:$0xff]  }
  0x51   : > { %680 = vmatpush1.bf16.msra.mxu1 %v2955_v12  ;;  %640 = vmatprep.subr.bf16.mxu0 %v2962_v13  ;;  %v3085_v32 = vld [vmem:[%s3709_s2 + $0xe0] ss:$16 sps:$4 sm:$0xff]   ;;  %3731 = vst [vmem:[#allocation8_spill] sm:$0xff] %v3137_v37  ;;  %v403_v38 = vsub.s32 2, %v394_v36  ;;  %v3139_v40 = vsub.s32 1, %v394_v36  ;;  %v407_v52 = vsub.s32 3, %v394_v36 }
  0x52   : > { %681 = vmatprep.subr.bf16.mxu1 %v2969_v14  ;;  %v384_v39 = vld [vmem:[#allocation2] sm:$0xf]  ;;  %vm2749_vm2 = vmmov 0   ;;  %vm2052_vm4 = vcmask 523264   ;;  %vm2096_vm5 = vcmask 31744  }
  0x53   : > { %3732 = vst [vmem:[#allocation9_spill] sm:$0xff] %v3139_v40  ;;  %v3142_v41 = vrot.slane %v384_v39, %v3137_v37  ;;  %v3144_v42 = vrot.slane %v384_v39, %v403_v38  ;;  %v385_v44 = vld [vmem:[%s3710_s3] sm:$0xf]  ;;  %v3150_v45 = vrot.slane %v384_v39, %v3139_v40  ;;  %v3166_v58 = vrot.slane %v384_v39, %v407_v52 }
  0x54   : > { %641 = vmatpush1.bf16.msra.mxu0 %v2974_v15  ;;  %2381 = vset.pattern.permute.xlu0 %v2741_v34  ;;  %v3154_v47 = vrot.slane %v385_v44, %v3137_v37  ;;  %v3157_v49 = vrot.slane %v385_v44, %v403_v38  ;;  %v3161_v51 = vrot.slane %v385_v44, %v3139_v40 }
  0x55   : > { %682 = vmatpush1.bf16.msra.mxu1 %v2984_v16  ;;  %642 = vmatprep.subr.bf16.mxu0 %v2989_v17  ;;  %v3169_v37 = vrot.slane %v385_v44, %v407_v52 }
  0x56   : > { %683 = vmatprep.subr.bf16.mxu1 %v2996_v18  ;;  %752 = vperm.xlu0 %2381, %v3055_v27  }
  0x58   : > { %643 = vmatpush1.bf16.msra.mxu0 %v3001_v19 }
  0x59   : > { %684 = vmatpush1.bf16.msra.mxu1 %v3006_v20  ;;  %644 = vmatprep.subr.bf16.mxu0 %v3014_v21 }
  0x5a   : > { %685 = vmatprep.subr.bf16.mxu1 %v3021_v22 }
  0x5c   : > { %645 = vmatpush1.bf16.msra.mxu0 %v3035_v23 }
  0x5d   : > { %686 = vmatpush1.bf16.msra.mxu1 %v3040_v24  ;;  %646 = vmatprep.subr.bf16.mxu0 %v3047_v25 }
  0x5e   : > { %687 = vmatprep.subr.bf16.mxu1 %v3052_v26 }
  0x60   : > { %647 = vmatpush1.bf16.msra.mxu0 %v3060_v28 }
  0x61   : > { %688 = vmatpush1.bf16.msra.mxu1 %v3065_v29  ;;  %648 = vmatprep.subr.bf16.mxu0 %v3071_v30 }
  0x62   : > { %689 = vmatprep.subr.bf16.mxu1 %v3076_v31 }
  0x64   : > { %649 = vmatpush1.bf16.msra.mxu0 %v3085_v32 }
  0x65   : > { %690 = vmatpush1.bf16.msra.mxu1 %v3090_v33  ;;  %764 = vmatprep.subr.bf16.mxu0 %v2893_v1 }
  0x66   : > { %805 = vmatprep.subr.bf16.mxu1 %v2898_v2 }
  0x67   : > { %667 = vmatmul.mubr.bf16.vlgmr.msra.gmra.mrb[0].mxu0 %v3720_v0 }
  0x68   : > { %708 = vmatmul.mubr.bf16.vlgmr.msra.gmra.mrb[0].mxu1 %v3720_v0  ;;  %765 = vmatpush1.bf16.msra.mxu0 %v2904_v3 }
  0x69   : > { %806 = vmatpush1.bf16.msra.mxu1 %v2909_v4  ;;  %766 = vmatprep.subr.bf16.mxu0 %v2915_v5 }
  0x6a   : > { %807 = vmatprep.subr.bf16.mxu1 %v2922_v6  ;;  %796 = vmatprep.mubr.bf16.mxu0 %v3720_v0 }
  0x6b   : > { %837 = vmatprep.mubr.bf16.mxu1 %v3720_v0 }
  0x6c   : > { %767 = vmatpush1.bf16.msra.mxu0 %v2927_v7 }
  0x6d   : > { %808 = vmatpush1.bf16.msra.mxu1 %v2933_v8  ;;  %768 = vmatprep.subr.bf16.mxu0 %v2939_v9 }
  0x6e   : > { %809 = vmatprep.subr.bf16.mxu1 %v2945_v10 }
  0x70   : > { %769 = vmatpush1.bf16.msra.mxu0 %v2950_v11 }
  0x71   : > { %810 = vmatpush1.bf16.msra.mxu1 %v2955_v12  ;;  %770 = vmatprep.subr.bf16.mxu0 %v2962_v13 }
  0x72   : > { %811 = vmatprep.subr.bf16.mxu1 %v2969_v14 }
  0x74   : > { %771 = vmatpush1.bf16.msra.mxu0 %v2974_v15 }
  0x75   : > { %812 = vmatpush1.bf16.msra.mxu1 %v2984_v16  ;;  %772 = vmatprep.subr.bf16.mxu0 %v2989_v17 }
  0x76   : > { %813 = vmatprep.subr.bf16.mxu1 %v2996_v18 }
  0x78   : > { %773 = vmatpush1.bf16.msra.mxu0 %v3001_v19 }
  0x79   : > { %814 = vmatpush1.bf16.msra.mxu1 %v3006_v20  ;;  %774 = vmatprep.subr.bf16.mxu0 %v3014_v21 }
  0x7a   : > { %815 = vmatprep.subr.bf16.mxu1 %v3021_v22 }
  0x7c   : > { %775 = vmatpush1.bf16.msra.mxu0 %v3035_v23 }
  0x7d   : > { %816 = vmatpush1.bf16.msra.mxu1 %v3040_v24  ;;  %776 = vmatprep.subr.bf16.mxu0 %v3047_v25 }
  0x7e   : > { %817 = vmatprep.subr.bf16.mxu1 %v3052_v26 }
  0x80   : > { %777 = vmatpush1.bf16.msra.mxu0 %v3060_v28 }
  0x81   : > { %818 = vmatpush1.bf16.msra.mxu1 %v3065_v29  ;;  %778 = vmatprep.subr.bf16.mxu0 %v3071_v30 }
  0x82   : > { %819 = vmatprep.subr.bf16.mxu1 %v3076_v31 }
  0x84   : > { %779 = vmatpush1.bf16.msra.mxu0 %v3085_v32 }
  0x85   : > { %820 = vmatpush1.bf16.msra.mxu1 %v3090_v33  ;;  %894 = vmatprep.subr.bf16.mxu0 %v2893_v1 }
  0x86   : > { %935 = vmatprep.subr.bf16.mxu1 %v2898_v2 }
  0xcf   : > { %v390_v43 = vpop.permute.xlu0 %389 }
  0xd0   : > { %v413_v46 = vmul.f32 %v3142_v41, %v390_v43  ;;  %v415_v48 = vmul.f32 %v3144_v42, %v390_v43  ;;  %v414_v50 = vmul.f32 %v3150_v45, %v390_v43 }
  0xd2   : > { %v438_v53 = vadd.f32 %v3154_v47, %v413_v46  ;;  %v440_v54 = vadd.f32 %v3157_v49, %v415_v48  ;;  %v439_v55 = vadd.f32 %v3161_v51, %v414_v50  ;;  %v416_v48 = vmul.f32 %v3166_v58, %v390_v43 }
  0xd4   : > { %v441_v39 = vadd.f32 %v3169_v37, %v416_v48 }
 0x13a   : > { %v668_v56 = vpop.f32.mrb[0].mxu0 }
 0x13b   : > { %v709_v57 = vpop.f32.mrb[0].mxu1  ;;  %v716_v59 = vadd.f32 %v668_v56, %v438_v53  ;;  %v670_v61 = vpop.f32.mrb[1].mxu0 }
 0x13c   : > { %v718_v60 = vadd.f32 %v709_v57, %v440_v54  ;;  %v711_v62 = vpop.f32.mrb[1].mxu1  ;;  %v717_v63 = vadd.f32 %v670_v61, %v439_v55  ;;  %v672_v34 = vpop.f32.mrb[2].mxu0 }
 0x13d   : > { %v713_v35 = vpop.f32.mrb[2].mxu1  ;;  %v2216_v38 = vmul.f32 -1.442695, %v716_v59  ;;  %v673_v36 = vpop.f32.mrb[3].mxu0  ;;  %v719_v50 = vadd.f32 %v711_v62, %v441_v39  ;;  %v3733_v39 = vmov 0  }
 0x13e   : > { %v2218_v0 = vmul.f32 -1.442695, %v718_v60  ;;  %v714_v40 = vpop.f32.mrb[3].mxu1  ;;  %v2217_v46 = vmul.f32 -1.442695, %v717_v63 }
 0x13f   : > { %2481 = vpow2.f32 %v2216_v38  ;;  %v2219_v55 = vmul.f32 -1.442695, %v719_v50  ;;  %v2742_v50 = vmov 2  }
 0x140   : > { %2483 = vpow2.f32 %v2218_v0  ;;  %2382 = vset.pattern.permute.xlu1 %v2742_v50 }
 0x141   : > { %2485 = vpow2.f32 %v2217_v46  ;;  %882 = vperm.xlu1 %2382, %v3055_v27  }
 0x149   : > { %v2482_v53 = vpop.eup %2481 }
 0x14a   : > { %v2484_v54 = vpop.eup %2483  ;;  %v732_v60 = vadd.f32 1.0, %v2482_v53  ;;  %v753_v53 = vpop.permute.xlu0 %752 }
 0x14b   : > { %v2486_v56 = vpop.eup %2485  ;;  %v734_v57 = vadd.f32 1.0, %v2484_v54  ;;  %v755_v54 = vmul.f32 %v753_v53, %v3142_v41 }
 0x14c   : > { %v733_v59 = vadd.f32 1.0, %v2486_v56  ;;  %v756_v56 = vmul.f32 %v753_v53, %v3150_v45 }
 0x14d   : > { %2487 = vrcp.f32 %v734_v57  ;;  %v759_v57 = vadd.f32 %v755_v54, %v3154_v47  ;;  %v758_v54 = vmul.f32 %v753_v53, %v3166_v58 }
 0x14e   : > { %2489 = vpow2.f32 %v2219_v55  ;;  %v757_v55 = vmul.f32 %v753_v53, %v3144_v42 }
 0x14f   : > { %2491 = vrcp.f32 %v733_v59 }
 0x150   : > { %2493 = vrcp.f32 %v732_v60  ;;  %v761_v59 = vadd.f32 %v757_v55, %v3157_v49  ;;  %v760_v60 = vadd.f32 %v756_v56, %v3161_v51  ;;  %v762_v55 = vadd.f32 %v758_v54, %v3169_v37 }
 0x157   : > { %v2488_v40 = vpop.eup %2487 }
 0x158   : > { %v2490_v43 = vpop.eup %2489  ;;  %v744_v44 = vmul.f32 2.0, %v2488_v40 }
 0x159   : > { %v2492_v52 = vpop.eup %2491  ;;  %v735_v63 = vadd.f32 1.0, %v2490_v43 }
 0x15a   : > { %v2220_v0 = vadd.f32 -1.0, %v744_v44  ;;  %v2494_v61 = vpop.eup %2493  ;;  %v746_v62 = vmul.f32 0.0, %v2492_v52 }
 0x15b   : > { %2495 = vrcp.f32 %v735_v63 }
 0x15c   : > { %v747_v34 = vmul.f32 %v2494_v61, %v2220_v0 }
 0x15e   : > { %v3172_v35 = vadd.f32 %v747_v34, %v746_v62 }
 0x160   : > { %2497 = vtanh.f32 %v3172_v35 }
 0x165   : > { %v2496_v38 = vpop.eup %2495 }
 0x16a   : > { %v2498_v36 = vpop.eup %2497 }
 0x16b   : > { %v750_v46 = vmul.f32 %v2498_v36, %v2496_v38 }
 0x16d   : > { %v763_v48 = vpack.c.bf16 %v750_v46, %v750_v46 }
 0x16f   : > { %797 = vmatmul.mubr.bf16.vlgmr.msra.gmra.mrb[4].mxu0 %v763_v48  ;;  %838 = vmatmul.mubr.bf16.vlgmr.msra.gmra.mrb[4].mxu1 %v763_v48 }
 0x170   : > { %895 = vmatpush1.bf16.msra.mxu0 %v2904_v3  ;;  %936 = vmatpush1.bf16.msra.mxu1 %v2909_v4 }
 0x171   : > { %896 = vmatprep.subr.bf16.mxu0 %v2915_v5  ;;  %937 = vmatprep.subr.bf16.mxu1 %v2922_v6 }
 0x172   : > { %926 = vmatprep.mubr.bf16.mxu0 %v3733_v39  ;;  %967 = vmatprep.mubr.bf16.mxu1 %v3733_v39 }
 0x174   : > { %897 = vmatpush1.bf16.msra.mxu0 %v2927_v7  ;;  %938 = vmatpush1.bf16.msra.mxu1 %v2933_v8 }
 0x175   : > { %898 = vmatprep.subr.bf16.mxu0 %v2939_v9  ;;  %939 = vmatprep.subr.bf16.mxu1 %v2945_v10 }
 0x178   : > { %899 = vmatpush1.bf16.msra.mxu0 %v2950_v11  ;;  %940 = vmatpush1.bf16.msra.mxu1 %v2955_v12 }
 0x179   : > { %900 = vmatprep.subr.bf16.mxu0 %v2962_v13  ;;  %941 = vmatprep.subr.bf16.mxu1 %v2969_v14 }
 0x17c   : > { %901 = vmatpush1.bf16.msra.mxu0 %v2974_v15  ;;  %942 = vmatpush1.bf16.msra.mxu1 %v2984_v16 }
 0x17d   : > { %902 = vmatprep.subr.bf16.mxu0 %v2989_v17  ;;  %943 = vmatprep.subr.bf16.mxu1 %v2996_v18 }
 0x180   : > { %903 = vmatpush1.bf16.msra.mxu0 %v3001_v19  ;;  %944 = vmatpush1.bf16.msra.mxu1 %v3006_v20 }
 0x181   : > { %904 = vmatprep.subr.bf16.mxu0 %v3014_v21  ;;  %945 = vmatprep.subr.bf16.mxu1 %v3021_v22 }
 0x184   : > { %905 = vmatpush1.bf16.msra.mxu0 %v3035_v23  ;;  %946 = vmatpush1.bf16.msra.mxu1 %v3040_v24 }
 0x185   : > { %906 = vmatprep.subr.bf16.mxu0 %v3047_v25  ;;  %947 = vmatprep.subr.bf16.mxu1 %v3052_v26 }
 0x188   : > { %907 = vmatpush1.bf16.msra.mxu0 %v3060_v28  ;;  %948 = vmatpush1.bf16.msra.mxu1 %v3065_v29 }
 0x189   : > { %908 = vmatprep.subr.bf16.mxu0 %v3071_v30  ;;  %949 = vmatprep.subr.bf16.mxu1 %v3076_v31 }
 0x18c   : > { %909 = vmatpush1.bf16.msra.mxu0 %v3085_v32  ;;  %950 = vmatpush1.bf16.msra.mxu1 %v3090_v33 }
 0x18d   : > { %1024 = vmatprep.subr.bf16.mxu0 %v2893_v1  ;;  %1065 = vmatprep.subr.bf16.mxu1 %v2898_v2 }
 0x242   : > { %v798_v40 = vpop.f32.mrb[4].mxu0  ;;  %v839_v43 = vpop.f32.mrb[4].mxu1 }
 0x243   : > { %v846_v44 = vadd.f32 %v798_v40, %v759_v57  ;;  %v848_v52 = vadd.f32 %v839_v43, %v761_v59  ;;  %v800_v0 = vpop.f32.mrb[5].mxu0  ;;  %v841_v61 = vpop.f32.mrb[5].mxu1 }
 0x244   : > { %v847_v63 = vadd.f32 %v800_v0, %v760_v60  ;;  %v802_v34 = vpop.f32.mrb[6].mxu0  ;;  %v843_v62 = vpop.f32.mrb[6].mxu1  ;;  %v849_v56 = vadd.f32 %v841_v61, %v762_v55 }
 0x245   : > { %v2221_v38 = vmul.f32 -1.442695, %v846_v44  ;;  %v2223_v36 = vmul.f32 -1.442695, %v848_v52  ;;  %v803_v46 = vpop.f32.mrb[7].mxu0  ;;  %v844_v48 = vpop.f32.mrb[7].mxu1 }
 0x246   : > { %v2222_v50 = vmul.f32 -1.442695, %v847_v63  ;;  %v2224_v40 = vmul.f32 -1.442695, %v849_v56 }
 0x247   : > { %2499 = vpow2.f32 %v2221_v38 }
 0x248   : > { %2501 = vpow2.f32 %v2223_v36 }
 0x249   : > { %2503 = vpow2.f32 %v2222_v50 }
 0x251   : > { %v2500_v57 = vpop.eup %2499 }
 0x252   : > { %v2502_v59 = vpop.eup %2501  ;;  %v862_v34 = vadd.f32 1.0, %v2500_v57  ;;  %v883_v57 = vpop.permute.xlu1 %882 }
 0x253   : > { %v2504_v43 = vpop.eup %2503  ;;  %v864_v60 = vadd.f32 1.0, %v2502_v59  ;;  %v885_v59 = vmul.f32 %v883_v57, %v3142_v41 }
 0x254   : > { %v863_v0 = vadd.f32 1.0, %v2504_v43  ;;  %v886_v43 = vmul.f32 %v883_v57, %v3150_v45 }
 0x255   : > { %2505 = vrcp.f32 %v864_v60  ;;  %v889_v60 = vadd.f32 %v885_v59, %v3154_v47  ;;  %v888_v59 = vmul.f32 %v883_v57, %v3166_v58 }
 0x256   : > { %2507 = vpow2.f32 %v2224_v40  ;;  %v887_v40 = vmul.f32 %v883_v57, %v3144_v42 }
 0x257   : > { %2509 = vrcp.f32 %v863_v0 }
 0x258   : > { %2511 = vrcp.f32 %v862_v34  ;;  %v891_v0 = vadd.f32 %v887_v40, %v3157_v49  ;;  %v890_v34 = vadd.f32 %v886_v43, %v3161_v51  ;;  %v892_v40 = vadd.f32 %v888_v59, %v3169_v37 }
 0x25f   : > { %v2506_v44 = vpop.eup %2505 }
 0x260   : > { %v2508_v52 = vpop.eup %2507  ;;  %v874_v53 = vmul.f32 2.0, %v2506_v44 }
 0x261   : > { %v2510_v63 = vpop.eup %2509  ;;  %v865_v36 = vadd.f32 1.0, %v2508_v52 }
 0x262   : > { %v2225_v62 = vadd.f32 -1.0, %v874_v53  ;;  %v2512_v38 = vpop.eup %2511  ;;  %v876_v61 = vmul.f32 %v2510_v63, %v3172_v35  ;;  %v2743_v35 = vmov 3  }
 0x263   : > { %2513 = vrcp.f32 %v865_v36  ;;  %2383 = vset.pattern.permute.xlu1 %v2743_v35 }
 0x264   : > { %v877_v46 = vmul.f32 %v2512_v38, %v2225_v62  ;;  %1012 = vperm.xlu1 %2383, %v3055_v27  }
 0x266   : > { %v3219_v48 = vadd.f32 %v877_v46, %v876_v61 }
 0x268   : > { %2515 = vtanh.f32 %v3219_v48 }
 0x26d   : > { %v2514_v50 = vpop.eup %2513 }
 0x272   : > { %v2516_v54 = vpop.eup %2515 }
 0x273   : > { %v880_v55 = vmul.f32 %v2516_v54, %v2514_v50 }
 0x275   : > { %v893_v56 = vpack.c.bf16 %v880_v55, %v880_v55 }
 0x277   : > { %927 = vmatmul.mubr.bf16.vlgmr.msra.gmra.mrb[8].mxu0 %v893_v56  ;;  %968 = vmatmul.mubr.bf16.vlgmr.msra.gmra.mrb[8].mxu1 %v893_v56 }
 0x278   : > { %1025 = vmatpush1.bf16.msra.mxu0 %v2904_v3  ;;  %1066 = vmatpush1.bf16.msra.mxu1 %v2909_v4 }
 0x279   : > { %1026 = vmatprep.subr.bf16.mxu0 %v2915_v5  ;;  %1067 = vmatprep.subr.bf16.mxu1 %v2922_v6 }
 0x27a   : > { %1056 = vmatprep.mubr.bf16.mxu0 %v3733_v39  ;;  %1097 = vmatprep.mubr.bf16.mxu1 %v3733_v39 }
 0x27c   : > { %1027 = vmatpush1.bf16.msra.mxu0 %v2927_v7  ;;  %1068 = vmatpush1.bf16.msra.mxu1 %v2933_v8 }
 0x27d   : > { %1028 = vmatprep.subr.bf16.mxu0 %v2939_v9  ;;  %1069 = vmatprep.subr.bf16.mxu1 %v2945_v10 }
 0x280   : > { %1029 = vmatpush1.bf16.msra.mxu0 %v2950_v11  ;;  %1070 = vmatpush1.bf16.msra.mxu1 %v2955_v12 }
 0x281   : > { %1030 = vmatprep.subr.bf16.mxu0 %v2962_v13  ;;  %1071 = vmatprep.subr.bf16.mxu1 %v2969_v14 }
 0x284   : > { %1031 = vmatpush1.bf16.msra.mxu0 %v2974_v15  ;;  %1072 = vmatpush1.bf16.msra.mxu1 %v2984_v16 }
 0x285   : > { %1032 = vmatprep.subr.bf16.mxu0 %v2989_v17  ;;  %1073 = vmatprep.subr.bf16.mxu1 %v2996_v18 }
 0x288   : > { %1033 = vmatpush1.bf16.msra.mxu0 %v3001_v19  ;;  %1074 = vmatpush1.bf16.msra.mxu1 %v3006_v20 }
 0x289   : > { %1034 = vmatprep.subr.bf16.mxu0 %v3014_v21  ;;  %1075 = vmatprep.subr.bf16.mxu1 %v3021_v22 }
 0x28c   : > { %1035 = vmatpush1.bf16.msra.mxu0 %v3035_v23  ;;  %1076 = vmatpush1.bf16.msra.mxu1 %v3040_v24 }
 0x28d   : > { %1036 = vmatprep.subr.bf16.mxu0 %v3047_v25  ;;  %1077 = vmatprep.subr.bf16.mxu1 %v3052_v26 }
 0x290   : > { %1037 = vmatpush1.bf16.msra.mxu0 %v3060_v28  ;;  %1078 = vmatpush1.bf16.msra.mxu1 %v3065_v29 }
 0x291   : > { %1038 = vmatprep.subr.bf16.mxu0 %v3071_v30  ;;  %1079 = vmatprep.subr.bf16.mxu1 %v3076_v31 }
 0x294   : > { %1039 = vmatpush1.bf16.msra.mxu0 %v3085_v32  ;;  %1080 = vmatpush1.bf16.msra.mxu1 %v3090_v33 }
 0x295   : > { %1154 = vmatprep.subr.bf16.mxu0 %v2893_v1  ;;  %1195 = vmatprep.subr.bf16.mxu1 %v2898_v2 }
 0x34a   : > { %v928_v44 = vpop.f32.mrb[8].mxu0  ;;  %v969_v52 = vpop.f32.mrb[8].mxu1 }
 0x34b   : > { %v976_v53 = vadd.f32 %v928_v44, %v889_v60  ;;  %v978_v63 = vadd.f32 %v969_v52, %v891_v0  ;;  %v930_v62 = vpop.f32.mrb[9].mxu0  ;;  %v971_v38 = vpop.f32.mrb[9].mxu1 }
 0x34c   : > { %v977_v36 = vadd.f32 %v930_v62, %v890_v34  ;;  %v932_v46 = vpop.f32.mrb[10].mxu0  ;;  %v973_v61 = vpop.f32.mrb[10].mxu1  ;;  %v979_v43 = vadd.f32 %v971_v38, %v892_v40 }
 0x34d   : > { %v2226_v50 = vmul.f32 -1.442695, %v976_v53  ;;  %v2228_v54 = vmul.f32 -1.442695, %v978_v63  ;;  %v933_v55 = vpop.f32.mrb[11].mxu0  ;;  %v974_v56 = vpop.f32.mrb[11].mxu1 }
 0x34e   : > { %v2227_v35 = vmul.f32 -1.442695, %v977_v36  ;;  %v2229_v44 = vmul.f32 -1.442695, %v979_v43 }
 0x34f   : > { %2517 = vpow2.f32 %v2226_v50 }
 0x350   : > { %2519 = vpow2.f32 %v2228_v54 }
 0x351   : > { %2521 = vpow2.f32 %v2227_v35 }
 0x359   : > { %v2518_v60 = vpop.eup %2517 }
 0x35a   : > { %v2520_v0 = vpop.eup %2519  ;;  %v992_v46 = vadd.f32 1.0, %v2518_v60 }
 0x35b   : > { %v2522_v52 = vpop.eup %2521  ;;  %v994_v34 = vadd.f32 1.0, %v2520_v0 }
 0x35c   : > { %v993_v62 = vadd.f32 1.0, %v2522_v52 }
 0x35d   : > { %2523 = vrcp.f32 %v994_v34 }
 0x35e   : > { %2525 = vpow2.f32 %v2229_v44 }
 0x35f   : > { %2527 = vrcp.f32 %v993_v62 }
 0x360   : > { %2529 = vrcp.f32 %v992_v46 }
 0x367   : > { %v2524_v53 = vpop.eup %2523 }
 0x368   : > { %v2526_v63 = vpop.eup %2525  ;;  %v1004_v57 = vmul.f32 2.0, %v2524_v53 }
 0x369   : > { %v2528_v36 = vpop.eup %2527  ;;  %v995_v54 = vadd.f32 1.0, %v2526_v63 }
 0x36a   : > { %v2230_v61 = vadd.f32 -1.0, %v1004_v57  ;;  %v2530_v50 = vpop.eup %2529  ;;  %v1006_v38 = vmul.f32 %v2528_v36, %v3219_v48 }
 0x36b   : > { %2531 = vrcp.f32 %v995_v54 }
 0x36c   : > { %v1007_v55 = vmul.f32 %v2530_v50, %v2230_v61 }
 0x36e   : > { %v3266_v56 = vadd.f32 %v1007_v55, %v1006_v38 }
 0x370   : > { %2533 = vtanh.f32 %v3266_v56 }
 0x375   : > { %v2532_v35 = vpop.eup %2531 }
 0x37a   : > { %v2534_v59 = vpop.eup %2533 }
 0x37b   : > { %v1010_v40 = vmul.f32 %v2534_v59, %v2532_v35 }
 0x37d   : > { %v1023_v43 = vpack.c.bf16 %v1010_v40, %v1010_v40 }
 0x37f   : > { %1057 = vmatmul.mubr.bf16.vlgmr.msra.gmra.mrb[12].mxu0 %v1023_v43  ;;  %1098 = vmatmul.mubr.bf16.vlgmr.msra.gmra.mrb[12].mxu1 %v1023_v43 }
 0x380   : > { %1155 = vmatpush1.bf16.msra.mxu0 %v2904_v3  ;;  %1196 = vmatpush1.bf16.msra.mxu1 %v2909_v4  ;;  %v2744_v3 = vmov 4   ;;  %v1013_v4 = vpop.permute.xlu1 %1012 }
 0x381   : > { %1156 = vmatprep.subr.bf16.mxu0 %v2915_v5  ;;  %1197 = vmatprep.subr.bf16.mxu1 %v2922_v6  ;;  %v1015_v5 = vmul.f32 %v1013_v4, %v3142_v41  ;;  %v1017_v6 = vmul.f32 %v1013_v4, %v3144_v42  ;;  %v1018_v52 = vmul.f32 %v1013_v4, %v3166_v58 }
 0x382   : > { %1186 = vmatprep.mubr.bf16.mxu0 %v3733_v39  ;;  %1227 = vmatprep.mubr.bf16.mxu1 %v3733_v39 }
 0x383   : > { %2384 = vset.pattern.permute.xlu1 %v2744_v3  ;;  %v1022_v34 = vadd.f32 %v1018_v52, %v3169_v37 }
 0x384   : > { %1157 = vmatpush1.bf16.msra.mxu0 %v2927_v7  ;;  %1198 = vmatpush1.bf16.msra.mxu1 %v2933_v8  ;;  %v1016_v7 = vmul.f32 %v1013_v4, %v3150_v45  ;;  %v1019_v8 = vadd.f32 %v1015_v5, %v3154_v47 }
 0x385   : > { %1158 = vmatprep.subr.bf16.mxu0 %v2939_v9  ;;  %1199 = vmatprep.subr.bf16.mxu1 %v2945_v10  ;;  %v1021_v9 = vadd.f32 %v1017_v6, %v3157_v49 }
 0x386   : > { %1142 = vperm.xlu1 %2384, %v3055_v27   ;;  %v1020_v10 = vadd.f32 %v1016_v7, %v3161_v51 }
 0x388   : > { %1159 = vmatpush1.bf16.msra.mxu0 %v2950_v11  ;;  %1200 = vmatpush1.bf16.msra.mxu1 %v2955_v12 }
 0x389   : > { %1160 = vmatprep.subr.bf16.mxu0 %v2962_v13  ;;  %1201 = vmatprep.subr.bf16.mxu1 %v2969_v14 }
 0x38c   : > { %1161 = vmatpush1.bf16.msra.mxu0 %v2974_v15  ;;  %1202 = vmatpush1.bf16.msra.mxu1 %v2984_v16 }
 0x38d   : > { %1162 = vmatprep.subr.bf16.mxu0 %v2989_v17  ;;  %1203 = vmatprep.subr.bf16.mxu1 %v2996_v18 }
 0x390   : > { %1163 = vmatpush1.bf16.msra.mxu0 %v3001_v19  ;;  %1204 = vmatpush1.bf16.msra.mxu1 %v3006_v20 }
 0x391   : > { %1164 = vmatprep.subr.bf16.mxu0 %v3014_v21  ;;  %1205 = vmatprep.subr.bf16.mxu1 %v3021_v22 }
 0x394   : > { %1165 = vmatpush1.bf16.msra.mxu0 %v3035_v23  ;;  %1206 = vmatpush1.bf16.msra.mxu1 %v3040_v24 }
 0x395   : > { %1166 = vmatprep.subr.bf16.mxu0 %v3047_v25  ;;  %1207 = vmatprep.subr.bf16.mxu1 %v3052_v26 }
 0x398   : > { %1167 = vmatpush1.bf16.msra.mxu0 %v3060_v28  ;;  %1208 = vmatpush1.bf16.msra.mxu1 %v3065_v29 }
 0x399   : > { %1168 = vmatprep.subr.bf16.mxu0 %v3071_v30  ;;  %1209 = vmatprep.subr.bf16.mxu1 %v3076_v31 }
 0x39c   : > { %1169 = vmatpush1.bf16.msra.mxu0 %v3085_v32  ;;  %1210 = vmatpush1.bf16.msra.mxu1 %v3090_v33 }
 0x39d   : > { %1284 = vmatprep.subr.bf16.mxu0 %v2893_v1  ;;  %1325 = vmatprep.subr.bf16.mxu1 %v2898_v2 }
 0x452   : > { %v1058_v1 = vpop.f32.mrb[12].mxu0  ;;  %v1099_v11 = vpop.f32.mrb[12].mxu1 }
 0x453   : > { %v1106_v2 = vadd.f32 %v1058_v1, %v1019_v8  ;;  %v1108_v12 = vadd.f32 %v1099_v11, %v1021_v9  ;;  %v1060_v13 = vpop.f32.mrb[13].mxu0  ;;  %v1101_v14 = vpop.f32.mrb[13].mxu1  ;;  %v3331_v1 = vld [vmem:[%s3709_s2 + $0x24] ss:$16 sps:$4 sm:$0xff]   ;;  %v3337_v11 = vld [vmem:[%s3709_s2 + $0x2c] ss:$16 sps:$4 sm:$0xff]  }
 0x454   : > { %v1107_v15 = vadd.f32 %v1060_v13, %v1020_v10  ;;  %v1062_v16 = vpop.f32.mrb[14].mxu0  ;;  %v1103_v17 = vpop.f32.mrb[14].mxu1  ;;  %v1109_v62 = vadd.f32 %v1101_v14, %v1022_v34  ;;  %v3319_v10 = vld [vmem:[%s3709_s2] ss:$16 sps:$4 sm:$0xff]   ;;  %v3357_v13 = vld [vmem:[%s3709_s2 + $0x44] ss:$16 sps:$4 sm:$0xff]  }
 0x455   : > { %v2231_v18 = vmul.f32 -1.442695, %v1106_v2  ;;  %v2233_v48 = vmul.f32 -1.442695, %v1108_v12  ;;  %v1063_v60 = vpop.f32.mrb[15].mxu0  ;;  %v1104_v0 = vpop.f32.mrb[15].mxu1 }
 0x456   : > { %v2232_v44 = vmul.f32 -1.442695, %v1107_v15  ;;  %v2234_v63 = vmul.f32 -1.442695, %v1109_v62  ;;  %v3345_v2 = vld [vmem:[%s3709_s2 + $0x20] ss:$16 sps:$4 sm:$0xff]  }
 0x457   : > { %2535 = vpow2.f32 %v2231_v18  ;;  %v3351_v12 = vld [vmem:[%s3709_s2 + $0x28] ss:$16 sps:$4 sm:$0xff]   ;;  %v3363_v14 = vld [vmem:[%s3709_s2 + $0x4c] ss:$16 sps:$4 sm:$0xff]   ;;  %v3369_v15 = vld [vmem:[%s3709_s2 + $0x40] ss:$16 sps:$4 sm:$0xff]  }
 0x458   : > { %2537 = vpow2.f32 %v2233_v48  ;;  %v3375_v16 = vld [vmem:[%s3709_s2 + $0x48] ss:$16 sps:$4 sm:$0xff]   ;;  %v3381_v17 = vld [vmem:[%s3709_s2 + $0x64] ss:$16 sps:$4 sm:$0xff]   ;;  %v3387_v18 = vld [vmem:[%s3709_s2 + $0x6c] ss:$16 sps:$4 sm:$0xff]  }
 0x459   : > { %2539 = vpow2.f32 %v2232_v44  ;;  %v3393_v48 = vld [vmem:[%s3709_s2 + $0x60] ss:$16 sps:$4 sm:$0xff]   ;;  %v3399_v60 = vld [vmem:[%s3709_s2 + $0x68] ss:$16 sps:$4 sm:$0xff]   ;;  %v3405_v0 = vld [vmem:[%s3709_s2 + $0x84] ss:$16 sps:$4 sm:$0xff]  }
 0x45a   : > { %v3411_v44 = vld [vmem:[%s3709_s2 + $0x8c] ss:$16 sps:$4 sm:$0xff]  }
 0x461   : > { %v2536_v46 = vpop.eup %2535 }
 0x462   : > { %v2538_v53 = vpop.eup %2537  ;;  %v1122_v50 = vadd.f32 1.0, %v2536_v46 }
 0x463   : > { %v2540_v57 = vpop.eup %2539  ;;  %v1124_v36 = vadd.f32 1.0, %v2538_v53 }
 0x464   : > { %v1123_v61 = vadd.f32 1.0, %v2540_v57 }
 0x465   : > { %2541 = vrcp.f32 %v1124_v36 }
 0x466   : > { %2543 = vpow2.f32 %v2234_v63 }
 0x467   : > { %2545 = vrcp.f32 %v1123_v61 }
 0x468   : > { %2547 = vrcp.f32 %v1122_v50 }
 0x46f   : > { %v2542_v54 = vpop.eup %2541 }
 0x470   : > { %v2544_v55 = vpop.eup %2543  ;;  %v1134_v38 = vmul.f32 2.0, %v2542_v54 }
 0x471   : > { %v2546_v35 = vpop.eup %2545  ;;  %v1125_v43 = vadd.f32 1.0, %v2544_v55 }
 0x472   : > { %v2235_v59 = vadd.f32 -1.0, %v1134_v38  ;;  %v2548_v40 = vpop.eup %2547  ;;  %v1136_v4 = vmul.f32 %v2546_v35, %v3266_v56  ;;  %v3325_v56 = vld [vmem:[%s3709_s2 + $0x8] ss:$16 sps:$4 sm:$0xff]  }
 0x473   : > { %2549 = vrcp.f32 %v1125_v43 }
 0x474   : > { %v1137_v3 = vmul.f32 %v2548_v40, %v2235_v59 }
 0x476   : > { %v3313_v5 = vadd.f32 %v1137_v3, %v1136_v4 }
 0x478   : > { %2551 = vtanh.f32 %v3313_v5 }
 0x47d   : > { %v2550_v6 = vpop.eup %2549 }
 0x482   : > { %v2552_v7 = vpop.eup %2551 }
 0x483   : > { %v1140_v8 = vmul.f32 %v2552_v7, %v2550_v6 }
 0x485   : > { %v1153_v9 = vpack.c.bf16 %v1140_v8, %v1140_v8 }
 0x487   : > { %1187 = vmatmul.mubr.bf16.vlgmr.msra.gmra.mrb[16].mxu0 %v1153_v9  ;;  %1228 = vmatmul.mubr.bf16.vlgmr.msra.gmra.mrb[16].mxu1 %v1153_v9 }
 0x488   : > { %1285 = vmatpush1.bf16.msra.mxu0 %v3319_v10  ;;  %1326 = vmatpush1.bf16.msra.mxu1 %v3325_v56 }
 0x489   : > { %1286 = vmatprep.subr.bf16.mxu0 %v3331_v1  ;;  %1327 = vmatprep.subr.bf16.mxu1 %v3337_v11 }
 0x48a   : > { %1316 = vmatprep.mubr.bf16.mxu0 %v3733_v39  ;;  %1357 = vmatprep.mubr.bf16.mxu1 %v3733_v39 }
 0x48c   : > { %1287 = vmatpush1.bf16.msra.mxu0 %v3345_v2  ;;  %1328 = vmatpush1.bf16.msra.mxu1 %v3351_v12 }
 0x48d   : > { %1288 = vmatprep.subr.bf16.mxu0 %v3357_v13  ;;  %1329 = vmatprep.subr.bf16.mxu1 %v3363_v14 }
 0x490   : > { %1289 = vmatpush1.bf16.msra.mxu0 %v3369_v15  ;;  %1330 = vmatpush1.bf16.msra.mxu1 %v3375_v16 }
 0x491   : > { %1290 = vmatprep.subr.bf16.mxu0 %v3381_v17  ;;  %1331 = vmatprep.subr.bf16.mxu1 %v3387_v18 }
 0x494   : > { %1291 = vmatpush1.bf16.msra.mxu0 %v3393_v48  ;;  %1332 = vmatpush1.bf16.msra.mxu1 %v3399_v60 }
 0x495   : > { %1292 = vmatprep.subr.bf16.mxu0 %v3405_v0  ;;  %1333 = vmatprep.subr.bf16.mxu1 %v3411_v44 }
 0x498   : > { %1293 = vmatpush1.bf16.msra.mxu0 %v3001_v19  ;;  %1334 = vmatpush1.bf16.msra.mxu1 %v3006_v20  ;;  %v3431_v19 = vld [vmem:[%s3709_s2 + $0x4] ss:$16 sps:$4 sm:$0xff]   ;;  %v3437_v20 = vld [vmem:[%s3709_s2 + $0xc] ss:$16 sps:$4 sm:$0xff]  }
 0x499   : > { %1294 = vmatprep.subr.bf16.mxu0 %v3014_v21  ;;  %1335 = vmatprep.subr.bf16.mxu1 %v3021_v22  ;;  %v2745_v21 = vmov 5   ;;  %v1143_v22 = vpop.permute.xlu1 %1142 }
 0x49a   : > { %2385 = vset.pattern.permute.xlu0 %v2745_v21  ;;  %v1148_v50 = vmul.f32 %v1143_v22, %v3166_v58 }
 0x49b   : > { %1272 = vperm.xlu0 %2385, %v3055_v27  }
 0x49c   : > { %1295 = vmatpush1.bf16.msra.mxu0 %v3035_v23  ;;  %1336 = vmatpush1.bf16.msra.mxu1 %v3040_v24  ;;  %v1145_v23 = vmul.f32 %v1143_v22, %v3142_v41  ;;  %v1147_v24 = vmul.f32 %v1143_v22, %v3144_v42  ;;  %v1152_v54 = vadd.f32 %v1148_v50, %v3169_v37  ;;  %v3552_v50 = vld [vmem:[%s3709_s2 + $0xe8] ss:$16 sps:$4 sm:$0xff]  }
 0x49d   : > { %1296 = vmatprep.subr.bf16.mxu0 %v3047_v25  ;;  %1337 = vmatprep.subr.bf16.mxu1 %v3052_v26  ;;  %v1146_v25 = vmul.f32 %v1143_v22, %v3150_v45 }
 0x49e   : > { %v1149_v26 = vadd.f32 %v1145_v23, %v3154_v47 }
 0x4a0   : > { %1297 = vmatpush1.bf16.msra.mxu0 %v3060_v28  ;;  %1338 = vmatpush1.bf16.msra.mxu1 %v3065_v29  ;;  %v1151_v28 = vadd.f32 %v1147_v24, %v3157_v49  ;;  %v1150_v29 = vadd.f32 %v1146_v25, %v3161_v51 }
 0x4a1   : > { %1298 = vmatprep.subr.bf16.mxu0 %v3071_v30  ;;  %1339 = vmatprep.subr.bf16.mxu1 %v3076_v31 }
 0x4a4   : > { %1299 = vmatpush1.bf16.msra.mxu0 %v3085_v32  ;;  %1340 = vmatpush1.bf16.msra.mxu1 %v3090_v33 }
 0x4a5   : > { %1414 = vmatprep.subr.bf16.mxu0 %v3431_v19  ;;  %1455 = vmatprep.subr.bf16.mxu1 %v3437_v20 }
 0x55a   : > { %v1188_v30 = vpop.f32.mrb[16].mxu0  ;;  %v1229_v31 = vpop.f32.mrb[16].mxu1 }
 0x55b   : > { %v1236_v32 = vadd.f32 %v1188_v30, %v1149_v26  ;;  %v1238_v33 = vadd.f32 %v1229_v31, %v1151_v28  ;;  %v1190_v52 = vpop.f32.mrb[17].mxu0  ;;  %v1231_v34 = vpop.f32.mrb[17].mxu1 }
 0x55c   : > { %v1237_v27 = vadd.f32 %v1190_v52, %v1150_v29  ;;  %v1192_v62 = vpop.f32.mrb[18].mxu0  ;;  %v1233_v46 = vpop.f32.mrb[18].mxu1  ;;  %v1239_v55 = vadd.f32 %v1231_v34, %v1152_v54  ;;  %v3492_v52 = vld [vmem:[%s3709_s2 + $0xac] ss:$16 sps:$4 sm:$0xff]   ;;  %v3498_v34 = vld [vmem:[%s3709_s2 + $0xa0] ss:$16 sps:$4 sm:$0xff]  }
 0x55d   : > { %v2236_v53 = vmul.f32 -1.442695, %v1236_v32  ;;  %v2238_v63 = vmul.f32 -1.442695, %v1238_v33  ;;  %v1193_v57 = vpop.f32.mrb[19].mxu0  ;;  %v1234_v36 = vpop.f32.mrb[19].mxu1 }
 0x55e   : > { %v2237_v61 = vmul.f32 -1.442695, %v1237_v27  ;;  %v2239_v59 = vmul.f32 -1.442695, %v1239_v55  ;;  %v3480_v32 = vld [vmem:[%s3709_s2 + $0x88] ss:$16 sps:$4 sm:$0xff]  }
 0x55f   : > { %2553 = vpow2.f32 %v2236_v53  ;;  %v3486_v33 = vld [vmem:[%s3709_s2 + $0xa4] ss:$16 sps:$4 sm:$0xff]   ;;  %v3504_v27 = vld [vmem:[%s3709_s2 + $0xa8] ss:$16 sps:$4 sm:$0xff]   ;;  %v3516_v46 = vld [vmem:[%s3709_s2 + $0xcc] ss:$16 sps:$4 sm:$0xff]  }
 0x560   : > { %2555 = vpow2.f32 %v2238_v63  ;;  %v3510_v62 = vld [vmem:[%s3709_s2 + $0xc4] ss:$16 sps:$4 sm:$0xff]   ;;  %v3522_v53 = vld [vmem:[%s3709_s2 + $0xc0] ss:$16 sps:$4 sm:$0xff]   ;;  %v3528_v63 = vld [vmem:[%s3709_s2 + $0xc8] ss:$16 sps:$4 sm:$0xff]  }
 0x561   : > { %2557 = vpow2.f32 %v2237_v61  ;;  %v3534_v57 = vld [vmem:[%s3709_s2 + $0xe4] ss:$16 sps:$4 sm:$0xff]   ;;  %v3540_v36 = vld [vmem:[%s3709_s2 + $0xec] ss:$16 sps:$4 sm:$0xff]   ;;  %v3546_v61 = vld [vmem:[%s3709_s2 + $0xe0] ss:$16 sps:$4 sm:$0xff]  }
 0x562   : > { %v2746_v54 = vmov 6   ;;  %v3558_v55 = vld [vmem:[%s3028_s22] sm:$0xff] }
 0x563   : > { %2386 = vset.pattern.permute.xlu1 %v2746_v54 }
 0x564   : > { %1402 = vperm.xlu1 %2386, %v3558_v55  }
 0x569   : > { %v2554_v38 = vpop.eup %2553 }
 0x56a   : > { %v2556_v35 = vpop.eup %2555  ;;  %v1252_v4 = vadd.f32 1.0, %v2554_v38  ;;  %v1273_v38 = vpop.permute.xlu0 %1272 }
 0x56b   : > { %v2558_v40 = vpop.eup %2557  ;;  %v1254_v43 = vadd.f32 1.0, %v2556_v35  ;;  %v1275_v35 = vmul.f32 %v1273_v38, %v3142_v41 }
 0x56c   : > { %v1253_v3 = vadd.f32 1.0, %v2558_v40  ;;  %v1276_v40 = vmul.f32 %v1273_v38, %v3150_v45 }
 0x56d   : > { %2559 = vrcp.f32 %v1254_v43  ;;  %v1279_v43 = vadd.f32 %v1275_v35, %v3154_v47 }
 0x56e   : > { %2561 = vpow2.f32 %v2239_v59  ;;  %v1277_v59 = vmul.f32 %v1273_v38, %v3144_v42 }
 0x56f   : > { %2563 = vrcp.f32 %v1253_v3 }
 0x570   : > { %2565 = vrcp.f32 %v1252_v4  ;;  %v1281_v3 = vadd.f32 %v1277_v59, %v3157_v49 }
 0x577   : > { %v2560_v6 = vpop.eup %2559 }
 0x578   : > { %v2562_v7 = vpop.eup %2561  ;;  %v1264_v8 = vmul.f32 2.0, %v2560_v6 }
 0x579   : > { %v2564_v9 = vpop.eup %2563  ;;  %v1255_v23 = vadd.f32 1.0, %v2562_v7 }
 0x57a   : > { %v2240_v21 = vadd.f32 -1.0, %v1264_v8  ;;  %v2566_v22 = vpop.eup %2565  ;;  %v1266_v25 = vmul.f32 %v2564_v9, %v3313_v5  ;;  %v3474_v5 = vld [vmem:[%s3709_s2 + $0x80] ss:$16 sps:$4 sm:$0xff]  }
 0x57b   : > { %2567 = vrcp.f32 %v1255_v23 }
 0x57c   : > { %v1267_v24 = vmul.f32 %v2566_v22, %v2240_v21 }
 0x57e   : > { %v3450_v26 = vadd.f32 %v1267_v24, %v1266_v25 }
 0x580   : > { %2569 = vtanh.f32 %v3450_v26 }
 0x585   : > { %v2568_v28 = vpop.eup %2567 }
 0x58a   : > { %v2570_v29 = vpop.eup %2569 }
 0x58b   : > { %v1270_v30 = vmul.f32 %v2570_v29, %v2568_v28 }
 0x58d   : > { %v1283_v31 = vpack.c.bf16 %v1270_v30, %v1270_v30  ;;  %v1278_v30 = vmul.f32 %v1273_v38, %v3166_v58 }
 0x58f   : > { %1317 = vmatmul.mubr.bf16.vlgmr.msra.gmra.mrb[20].mxu0 %v1283_v31  ;;  %1358 = vmatmul.mubr.bf16.vlgmr.msra.gmra.mrb[20].mxu1 %v1283_v31  ;;  %v1282_v54 = vadd.f32 %v1278_v30, %v3169_v37 }
 0x590   : > { %1415 = vmatpush1.bf16.msra.mxu0 %v3319_v10  ;;  %1456 = vmatpush1.bf16.msra.mxu1 %v3325_v56 }
 0x591   : > { %1416 = vmatprep.subr.bf16.mxu0 %v3331_v1  ;;  %1457 = vmatprep.subr.bf16.mxu1 %v3337_v11 }
 0x592   : > { %1446 = vmatprep.mubr.bf16.mxu0 %v3733_v39  ;;  %1487 = vmatprep.mubr.bf16.mxu1 %v3733_v39 }
 0x594   : > { %1417 = vmatpush1.bf16.msra.mxu0 %v3345_v2  ;;  %1458 = vmatpush1.bf16.msra.mxu1 %v3351_v12 }
 0x595   : > { %1418 = vmatprep.subr.bf16.mxu0 %v3357_v13  ;;  %1459 = vmatprep.subr.bf16.mxu1 %v3363_v14 }
 0x598   : > { %1419 = vmatpush1.bf16.msra.mxu0 %v3369_v15  ;;  %1460 = vmatpush1.bf16.msra.mxu1 %v3375_v16 }
 0x599   : > { %1420 = vmatprep.subr.bf16.mxu0 %v3381_v17  ;;  %1461 = vmatprep.subr.bf16.mxu1 %v3387_v18 }
 0x59c   : > { %1421 = vmatpush1.bf16.msra.mxu0 %v3393_v48  ;;  %1462 = vmatpush1.bf16.msra.mxu1 %v3399_v60 }
 0x59d   : > { %1422 = vmatprep.subr.bf16.mxu0 %v3405_v0  ;;  %1463 = vmatprep.subr.bf16.mxu1 %v3411_v44 }
 0x5a0   : > { %1423 = vmatpush1.bf16.msra.mxu0 %v3474_v5  ;;  %1464 = vmatpush1.bf16.msra.mxu1 %v3480_v32 }
 0x5a1   : > { %1424 = vmatprep.subr.bf16.mxu0 %v3486_v33  ;;  %1465 = vmatprep.subr.bf16.mxu1 %v3492_v52 }
 0x5a4   : > { %1425 = vmatpush1.bf16.msra.mxu0 %v3498_v34  ;;  %1466 = vmatpush1.bf16.msra.mxu1 %v3504_v27 }
 0x5a5   : > { %1426 = vmatprep.subr.bf16.mxu0 %v3510_v62  ;;  %1467 = vmatprep.subr.bf16.mxu1 %v3516_v46 }
 0x5a8   : > { %1427 = vmatpush1.bf16.msra.mxu0 %v3522_v53  ;;  %1468 = vmatpush1.bf16.msra.mxu1 %v3528_v63 }
 0x5a9   : > { %1428 = vmatprep.subr.bf16.mxu0 %v3534_v57  ;;  %1469 = vmatprep.subr.bf16.mxu1 %v3540_v36 }
 0x5ac   : > { %1429 = vmatpush1.bf16.msra.mxu0 %v3546_v61  ;;  %1470 = vmatpush1.bf16.msra.mxu1 %v3552_v50 }
 0x5ad   : > { %1544 = vmatprep.subr.bf16.mxu0 %v3431_v19  ;;  %1585 = vmatprep.subr.bf16.mxu1 %v3437_v20  ;;  %v1280_v19 = vadd.f32 %v1276_v40, %v3161_v51 }
 0x662   : > { %v1318_v20 = vpop.f32.mrb[20].mxu0  ;;  %v1359_v4 = vpop.f32.mrb[20].mxu1 }
 0x663   : > { %v1366_v6 = vadd.f32 %v1318_v20, %v1279_v43  ;;  %v1368_v7 = vadd.f32 %v1359_v4, %v1281_v3  ;;  %v1320_v8 = vpop.f32.mrb[21].mxu0  ;;  %v1361_v9 = vpop.f32.mrb[21].mxu1 }
 0x664   : > { %v1367_v21 = vadd.f32 %v1320_v8, %v1280_v19  ;;  %v1322_v22 = vpop.f32.mrb[22].mxu0  ;;  %v1363_v23 = vpop.f32.mrb[22].mxu1  ;;  %v1369_v35 = vadd.f32 %v1361_v9, %v1282_v54 }
 0x665   : > { %v2241_v24 = vmul.f32 -1.442695, %v1366_v6  ;;  %v2243_v25 = vmul.f32 -1.442695, %v1368_v7  ;;  %v1323_v28 = vpop.f32.mrb[23].mxu0  ;;  %v1364_v29 = vpop.f32.mrb[23].mxu1 }
 0x666   : > { %v2242_v31 = vmul.f32 -1.442695, %v1367_v21  ;;  %v2244_v43 = vmul.f32 -1.442695, %v1369_v35 }
 0x667   : > { %2571 = vpow2.f32 %v2241_v24 }
 0x668   : > { %2573 = vpow2.f32 %v2243_v25 }
 0x669   : > { %2575 = vpow2.f32 %v2242_v31 }
 0x671   : > { %v2572_v59 = vpop.eup %2571 }
 0x672   : > { %v2574_v40 = vpop.eup %2573  ;;  %v1382_v4 = vadd.f32 1.0, %v2572_v59 }
 0x673   : > { %v2576_v3 = vpop.eup %2575  ;;  %v1384_v19 = vadd.f32 1.0, %v2574_v40 }
 0x674   : > { %v1383_v20 = vadd.f32 1.0, %v2576_v3 }
 0x675   : > { %2577 = vrcp.f32 %v1384_v19 }
 0x676   : > { %2579 = vpow2.f32 %v2244_v43 }
 0x677   : > { %2581 = vrcp.f32 %v1383_v20 }
 0x678   : > { %2583 = vrcp.f32 %v1382_v4 }
 0x67f   : > { %v2578_v6 = vpop.eup %2577 }
 0x680   : > { %v2580_v38 = vpop.eup %2579  ;;  %v1394_v7 = vmul.f32 2.0, %v2578_v6 }
 0x681   : > { %v2582_v8 = vpop.eup %2581  ;;  %v1385_v23 = vadd.f32 1.0, %v2580_v38 }
 0x682   : > { %v2245_v21 = vadd.f32 -1.0, %v1394_v7  ;;  %v2584_v22 = vpop.eup %2583  ;;  %v1396_v9 = vmul.f32 %v2582_v8, %v3450_v26 }
 0x683   : > { %2585 = vrcp.f32 %v1385_v23  ;;  %v2437_v23 = vld [vmem:[#allocation4] ss:$8 sps:$4 sm:$0xff]  }
 0x684   : > { %v1397_v24 = vmul.f32 %v2584_v22, %v2245_v21  ;;  %v2439_v22 = vld [vmem:[#allocation4 + $0x4] ss:$8 sps:$4 sm:$0xff]  }
 0x686   : > { %v3570_v25 = vadd.f32 %v1397_v24, %v1396_v9  ;;  %v2442_v24 = vld [vmem:[#allocation4 + $0x14] ss:$8 sps:$4 sm:$0xff]   ;;  %v2440_v9 = vld [vmem:[#allocation4 + $0x10] ss:$8 sps:$4 sm:$0xff]  }
 0x688   : > { %2587 = vtanh.f32 %v3570_v25 }
 0x68d   : > { %v2586_v28 = vpop.eup %2585 }
 0x692   : > { %v2588_v29 = vpop.eup %2587 }
 0x693   : > { %v1400_v30 = vmul.f32 %v2588_v29, %v2586_v28  ;;  %v2443_v28 = vld [vmem:[#allocation4 + $0x20] ss:$8 sps:$4 sm:$0xff]   ;;  %v2448_v29 = vld [vmem:[#allocation4 + $0x34] ss:$8 sps:$4 sm:$0xff]  }
 0x695   : > { %v1413_v31 = vpack.c.bf16 %v1400_v30, %v1400_v30  ;;  %v2446_v30 = vld [vmem:[#allocation4 + $0x30] ss:$8 sps:$4 sm:$0xff]  }
 0x697   : > { %1447 = vmatmul.mubr.bf16.vlgmr.msra.gmra.mrb[24].mxu0 %v1413_v31  ;;  %1488 = vmatmul.mubr.bf16.vlgmr.msra.gmra.mrb[24].mxu1 %v1413_v31  ;;  %v2451_v31 = vld [vmem:[#allocation4 + $0x44] ss:$8 sps:$4 sm:$0xff]  }
 0x698   : > { %1545 = vmatpush1.bf16.msra.mxu0 %v3319_v10  ;;  %1586 = vmatpush1.bf16.msra.mxu1 %v3325_v56  ;;  %v2747_v10 = vmov 7   ;;  %v1403_v56 = vpop.permute.xlu1 %1402 }
 0x699   : > { %1546 = vmatprep.subr.bf16.mxu0 %v3331_v1  ;;  %1587 = vmatprep.subr.bf16.mxu1 %v3337_v11  ;;  %v1405_v1 = vmul.f32 %v1403_v56, %v3142_v41  ;;  %v1407_v11 = vmul.f32 %v1403_v56, %v3144_v42 }
 0x69a   : > { %1576 = vmatprep.mubr.bf16.mxu0 %v3733_v39  ;;  %1617 = vmatprep.mubr.bf16.mxu1 %v3733_v39 }
 0x69b   : > { %2387 = vset.pattern.permute.xlu1 %v2747_v10  ;;  %2388 = vset.pattern.permute.xlu0 %v2747_v10  ;;  %v2449_v10 = vld [vmem:[#allocation4 + $0x40] ss:$8 sps:$4 sm:$0xff]  }
 0x69c   : > { %1547 = vmatpush1.bf16.msra.mxu0 %v3345_v2  ;;  %1588 = vmatpush1.bf16.msra.mxu1 %v3351_v12  ;;  %v1406_v2 = vmul.f32 %v1403_v56, %v3150_v45  ;;  %v1409_v12 = vadd.f32 %v1405_v1, %v3154_v47  ;;  %v2457_v1 = vld [vmem:[#allocation4 + $0x64] ss:$8 sps:$4 sm:$0xff]  }
 0x69d   : > { %1548 = vmatprep.subr.bf16.mxu0 %v3357_v13  ;;  %1589 = vmatprep.subr.bf16.mxu1 %v3363_v14  ;;  %v1411_v13 = vadd.f32 %v1407_v11, %v3157_v49  ;;  %v2455_v11 = vld [vmem:[#allocation4 + $0x60] ss:$8 sps:$4 sm:$0xff]  }
 0x69e   : > { %1532 = vperm.xlu1 %2387, %v3558_v55   ;;  %v1410_v14 = vadd.f32 %v1406_v2, %v3161_v51  ;;  %v2460_v2 = vld [vmem:[#allocation4 + $0x74] ss:$8 sps:$4 sm:$0xff]  }
 0x6a0   : > { %1549 = vmatpush1.bf16.msra.mxu0 %v3369_v15  ;;  %1590 = vmatpush1.bf16.msra.mxu1 %v3375_v16 }
 0x6a1   : > { %1550 = vmatprep.subr.bf16.mxu0 %v3381_v17  ;;  %1591 = vmatprep.subr.bf16.mxu1 %v3387_v18 }
 0x6a4   : > { %1551 = vmatpush1.bf16.msra.mxu0 %v3393_v48  ;;  %1592 = vmatpush1.bf16.msra.mxu1 %v3399_v60 }
 0x6a5   : > { %1552 = vmatprep.subr.bf16.mxu0 %v3405_v0  ;;  %1593 = vmatprep.subr.bf16.mxu1 %v3411_v44 }
 0x6a8   : > { %1553 = vmatpush1.bf16.msra.mxu0 %v3474_v5  ;;  %1594 = vmatpush1.bf16.msra.mxu1 %v3480_v32 }
 0x6a9   : > { %1554 = vmatprep.subr.bf16.mxu0 %v3486_v33  ;;  %1595 = vmatprep.subr.bf16.mxu1 %v3492_v52 }
 0x6ac   : > { %1555 = vmatpush1.bf16.msra.mxu0 %v3498_v34  ;;  %1596 = vmatpush1.bf16.msra.mxu1 %v3504_v27  ;;  %v1408_v27 = vmul.f32 %v1403_v56, %v3166_v58  ;;  %v2452_v56 = vld [vmem:[#allocation4 + $0x50] ss:$8 sps:$4 sm:$0xff]  }
 0x6ad   : > { %1556 = vmatprep.subr.bf16.mxu0 %v3510_v62  ;;  %1597 = vmatprep.subr.bf16.mxu1 %v3516_v46 }
 0x6ae   : > { %v1412_v62 = vadd.f32 %v1408_v27, %v3169_v37 }
 0x6b0   : > { %1557 = vmatpush1.bf16.msra.mxu0 %v3522_v53  ;;  %1598 = vmatpush1.bf16.msra.mxu1 %v3528_v63 }
 0x6b1   : > { %1558 = vmatprep.subr.bf16.mxu0 %v3534_v57  ;;  %1599 = vmatprep.subr.bf16.mxu1 %v3540_v36 }
 0x6b4   : > { %1559 = vmatpush1.bf16.msra.mxu0 %v3546_v61  ;;  %1600 = vmatpush1.bf16.msra.mxu1 %v3552_v50 }
 0x6b5   : > { %1770 = vmatprep.subr.bf16.mxu0 %v2439_v22  ;;  %v2463_v22 = vld [vmem:[%s3713_s6 + $0x48] sm:$0xff]  }
 0x76a   : > { %v1448_v15 = vpop.f32.mrb[24].mxu0  ;;  %v1489_v16 = vpop.f32.mrb[24].mxu1 }
 0x76b   : > { %v1496_v17 = vadd.f32 %v1448_v15, %v1409_v12  ;;  %v1498_v18 = vadd.f32 %v1489_v16, %v1411_v13  ;;  %v1450_v48 = vpop.f32.mrb[25].mxu0  ;;  %v1491_v60 = vpop.f32.mrb[25].mxu1  ;;  %v2458_v12 = vld [vmem:[#allocation4 + $0x70] ss:$8 sps:$4 sm:$0xff]   ;;  %v2461_v13 = vld [vmem:[%s3713_s6 + $0x40] sm:$0xff]  }
 0x76c   : > { %v1497_v0 = vadd.f32 %v1450_v48, %v1410_v14  ;;  %v1452_v44 = vpop.f32.mrb[26].mxu0  ;;  %v1493_v26 = vpop.f32.mrb[26].mxu1  ;;  %v1499_v46 = vadd.f32 %v1491_v60, %v1412_v62  ;;  %v2462_v14 = vld [vmem:[%s3713_s6] sm:$0xff]   ;;  %2300 = vmatprep.subr.bf16.mxu1 %v2461_v13  ;;  %v3735_v13 = vld [vmem:[#allocation9_spill] sm:$0xff] }
 0x76d   : > { %v2246_v5 = vmul.f32 -1.442695, %v1496_v17  ;;  %v2248_v32 = vmul.f32 -1.442695, %v1498_v18  ;;  %v1453_v33 = vpop.f32.mrb[27].mxu0  ;;  %v1494_v52 = vpop.f32.mrb[27].mxu1 }
 0x76e   : > { %v2247_v34 = vmul.f32 -1.442695, %v1497_v0  ;;  %v2249_v57 = vmul.f32 -1.442695, %v1499_v46  ;;  %v1533_v15 = vpop.permute.xlu1 %1532 }
 0x76f   : > { %2589 = vpow2.f32 %v2246_v5  ;;  %v1535_v16 = vmul.f32 %v1533_v15, %v3142_v41  ;;  %v1537_v17 = vmul.f32 %v1533_v15, %v3144_v42  ;;  %v1536_v18 = vmul.f32 %v1533_v15, %v3150_v45 }
 0x770   : > { %2591 = vpow2.f32 %v2248_v32  ;;  %v1538_v45 = vmul.f32 %v1533_v15, %v3166_v58 }
 0x771   : > { %2593 = vpow2.f32 %v2247_v34  ;;  %v1539_v48 = vadd.f32 %v1535_v16, %v3154_v47  ;;  %v1541_v60 = vadd.f32 %v1537_v17, %v3157_v49  ;;  %v1540_v0 = vadd.f32 %v1536_v18, %v3161_v51 }
 0x772   : > { %v1542_v49 = vadd.f32 %v1538_v45, %v3169_v37 }
 0x779   : > { %v2590_v53 = vpop.eup %2589 }
 0x77a   : > { %v2592_v63 = vpop.eup %2591  ;;  %v1512_v55 = vadd.f32 1.0, %v2590_v53 }
 0x77b   : > { %v2594_v36 = vpop.eup %2593  ;;  %v1514_v61 = vadd.f32 1.0, %v2592_v63 }
 0x77c   : > { %v1513_v50 = vadd.f32 1.0, %v2594_v36 }
 0x77d   : > { %2595 = vrcp.f32 %v1514_v61 }
 0x77e   : > { %2597 = vpow2.f32 %v2249_v57 }
 0x77f   : > { %2599 = vrcp.f32 %v1513_v50 }
 0x780   : > { %2601 = vrcp.f32 %v1512_v55 }
 0x787   : > { %v2596_v54 = vpop.eup %2595 }
 0x788   : > { %v2598_v35 = vpop.eup %2597  ;;  %v1524_v59 = vmul.f32 2.0, %v2596_v54 }
 0x789   : > { %v2600_v40 = vpop.eup %2599  ;;  %v1515_v19 = vadd.f32 1.0, %v2598_v35 }
 0x78a   : > { %v2250_v43 = vadd.f32 -1.0, %v1524_v59  ;;  %v2602_v3 = vpop.eup %2601  ;;  %v1526_v4 = vmul.f32 %v2600_v40, %v3570_v25  ;;  %v2445_v25 = vld [vmem:[#allocation4 + $0x24] ss:$8 sps:$4 sm:$0xff]  }
 0x78b   : > { %2603 = vrcp.f32 %v1515_v19 }
 0x78c   : > { %v1527_v20 = vmul.f32 %v2602_v3, %v2250_v43 }
 0x78e   : > { %v3615_v6 = vadd.f32 %v1527_v20, %v1526_v4 }
 0x790   : > { %2605 = vtanh.f32 %v3615_v6 }
 0x795   : > { %v2604_v38 = vpop.eup %2603 }
 0x79a   : > { %v2606_v7 = vpop.eup %2605 }
 0x79b   : > { %v1530_v8 = vmul.f32 %v2606_v7, %v2604_v38 }
 0x79d   : > { %v1543_v21 = vpack.c.bf16 %v1530_v8, %v1530_v8 }
 0x79f   : > { %1577 = vmatmul.mubr.bf16.vlgmr.msra.gmra.mrb[28].mxu0 %v1543_v21  ;;  %1618 = vmatmul.mubr.bf16.vlgmr.msra.gmra.mrb[28].mxu1 %v1543_v21 }
 0x7a0   : > { %1802 = vmatprep.mubr.bf16.mxu0 %v3733_v39  ;;  %1771 = vmatpush1.bf16.msra.mxu0 %v2437_v23  ;;  %v2454_v39 = vld [vmem:[#allocation4 + $0x54] ss:$8 sps:$4 sm:$0xff]   ;;  %v2464_v23 = vld [vmem:[%s3713_s6 + $0x8] sm:$0xff]  }
 0x7a1   : > { %1772 = vmatprep.subr.bf16.mxu0 %v2442_v24  ;;  %2301 = vmatpush3.bf16.msra.mxu1 %v2462_v14  ;;  %v2466_v24 = vld [vmem:[%s3713_s6 + $0x10] sm:$0xff]  }
 0x7a2   : > { %2302 = vmatprep.subr.bf16.mxu1 %v2463_v22 }
 0x7a4   : > { %1773 = vmatpush1.bf16.msra.mxu0 %v2440_v9  ;;  %v2467_v9 = vld [vmem:[%s3713_s6 + $0x58] sm:$0xff]  }
 0x7a5   : > { %1774 = vmatprep.subr.bf16.mxu0 %v2445_v25  ;;  %2303 = vmatpush3.bf16.msra.mxu1 %v2464_v23  ;;  %v2468_v25 = vld [vmem:[%s3713_s6 + $0x18] sm:$0xff]  }
 0x7a8   : > { %1775 = vmatpush1.bf16.msra.mxu0 %v2443_v28  ;;  %v2469_v28 = vld [vmem:[%s3713_s6 + $0x60] sm:$0xff]  }
 0x7a9   : > { %1776 = vmatprep.subr.bf16.mxu0 %v2448_v29  ;;  %v2470_v29 = vld [vmem:[%s3713_s6 + $0x20] sm:$0xff]  }
 0x7ac   : > { %1777 = vmatpush1.bf16.msra.mxu0 %v2446_v30  ;;  %v2471_v30 = vld [vmem:[%s3713_s6 + $0x68] sm:$0xff]  }
 0x7ad   : > { %1778 = vmatprep.subr.bf16.mxu0 %v2451_v31  ;;  %v2472_v31 = vld [vmem:[%s3713_s6 + $0x28] sm:$0xff]  }
 0x7b0   : > { %1779 = vmatpush1.bf16.msra.mxu0 %v2449_v10  ;;  %v2473_v10 = vld [vmem:[%s3713_s6 + $0x70] sm:$0xff]  }
 0x7b1   : > { %1780 = vmatprep.subr.bf16.mxu0 %v2454_v39  ;;  %v2474_v39 = vld [vmem:[%s3713_s6 + $0x30] sm:$0xff]  }
 0x7b4   : > { %1781 = vmatpush1.bf16.msra.mxu0 %v2452_v56  ;;  %v2475_v56 = vld [vmem:[%s3713_s6 + $0x78] sm:$0xff]  }
 0x7b5   : > { %1782 = vmatprep.subr.bf16.mxu0 %v2457_v1  ;;  %v2476_v1 = vld [vmem:[%s3713_s6 + $0x38] sm:$0xff]  }
 0x7b8   : > { %1783 = vmatpush1.bf16.msra.mxu0 %v2455_v11  ;;  %v1678_v11 = vld [vmem:[%s3712_s5] sm:$0x3] }
 0x7b9   : > { %1784 = vmatprep.subr.bf16.mxu0 %v2460_v2  ;;  %v3734_v2 = vld [vmem:[#allocation8_spill] sm:$0xff]  ;;  %v1687_v14 = vrot.slane %v1678_v11, %v3735_v13 }
 0x7bc   : > { %1785 = vmatpush1.bf16.msra.mxu0 %v2458_v12  ;;  %v1683_v12 = vrot.slane %v1678_v11, %v3734_v2 }
 0x872   : > { %v1578_v44 = vpop.f32.mrb[28].mxu0  ;;  %v1619_v26 = vpop.f32.mrb[28].mxu1 }
 0x873   : > { %v1626_v5 = vadd.f32 %v1578_v44, %v1539_v48  ;;  %v1628_v32 = vadd.f32 %v1619_v26, %v1541_v60  ;;  %v1580_v33 = vpop.f32.mrb[29].mxu0  ;;  %v1621_v52 = vpop.f32.mrb[29].mxu1 }
 0x874   : > { %v1627_v34 = vadd.f32 %v1580_v33, %v1540_v0  ;;  %v1582_v27 = vpop.f32.mrb[30].mxu0  ;;  %v1623_v62 = vpop.f32.mrb[30].mxu1  ;;  %v1629_v51 = vadd.f32 %v1621_v52, %v1542_v49  ;;  %v2477_v49 = vld [vmem:[%s3715_s8] sm:$0xff]  }
 0x875   : > { %v2251_v41 = vmul.f32 -1.442695, %v1626_v5  ;;  %v2253_v46 = vmul.f32 -1.442695, %v1628_v32  ;;  %v1583_v42 = vpop.f32.mrb[31].mxu0  ;;  %v1624_v53 = vpop.f32.mrb[31].mxu1 }
 0x876   : > { %v2252_v47 = vmul.f32 -1.442695, %v1627_v34  ;;  %v2254_v36 = vmul.f32 -1.442695, %v1629_v51  ;;  %v2748_v51 = vmov 0.0  }
 0x877   : > { %2607 = vpow2.f32 %v2251_v41  ;;  %2327 = vmatprep.subr.bf16.mxu0 %v2748_v51 }
 0x878   : > { %2609 = vpow2.f32 %v2253_v46 }
 0x879   : > { %2611 = vpow2.f32 %v2252_v47 }
 0x881   : > { %v2608_v63 = vpop.eup %2607 }
 0x882   : > { %v2610_v57 = vpop.eup %2609  ;;  %v1642_v54 = vadd.f32 1.0, %v2608_v63  ;;  %v2478_v63 = vld [vmem:[%s3715_s8 + $0x8] sm:$0xff]  }
 0x883   : > { %v2612_v61 = vpop.eup %2611  ;;  %v1644_v50 = vadd.f32 1.0, %v2610_v57  ;;  %v2479_v57 = vld [vmem:[%s3715_s8 + $0x10] sm:$0xff]  }
 0x884   : > { %v1643_v55 = vadd.f32 1.0, %v2612_v61 }
 0x885   : > { %2613 = vrcp.f32 %v1644_v50  ;;  %v2274_v50 = vld [vmem:[%s3714_s7] ss:$0 sm:$0xff] }
 0x886   : > { %2615 = vpow2.f32 %v2254_v36  ;;  %v2480_v36 = vld [vmem:[%s3715_s8 + $0x18] sm:$0xff]  }
 0x887   : > { %2617 = vrcp.f32 %v1643_v55 }
 0x888   : > { %2619 = vrcp.f32 %v1642_v54 }
 0x88f   : > { %v2614_v35 = vpop.eup %2613 }
 0x890   : > { %v2616_v58 = vpop.eup %2615  ;;  %v1654_v59 = vmul.f32 2.0, %v2614_v35 }
 0x891   : > { %v2618_v40 = vpop.eup %2617  ;;  %v1645_v19 = vadd.f32 1.0, %v2616_v58 }
 0x892   : > { %v2255_v43 = vadd.f32 -1.0, %v1654_v59  ;;  %v2620_v3 = vpop.eup %2619  ;;  %v1656_v20 = vmul.f32 %v2618_v40, %v3615_v6  ;;  %v2465_v6 = vld [vmem:[%s3713_s6 + $0x50] sm:$0xff]  }
 0x893   : > { %2621 = vrcp.f32 %v1645_v19  ;;  %2304 = vmatprep.subr.bf16.mxu1 %v2465_v6 }
 0x894   : > { %v1657_v37 = vmul.f32 %v2620_v3, %v2255_v43  ;;  %2305 = vmatpush3.bf16.msra.mxu1 %v2466_v24 }
 0x895   : > { %2306 = vmatprep.subr.bf16.mxu1 %v2467_v9 }
 0x896   : > { %v1658_v4 = vadd.f32 %v1657_v37, %v1656_v20 }
 0x898   : > { %2623 = vtanh.f32 %v1658_v4  ;;  %2307 = vmatpush3.bf16.msra.mxu1 %v2468_v25 }
 0x899   : > { %2308 = vmatprep.subr.bf16.mxu1 %v2469_v28 }
 0x89c   : > { %2309 = vmatpush3.bf16.msra.mxu1 %v2470_v29 }
 0x89d   : > { %v2622_v38 = vpop.eup %2621  ;;  %2310 = vmatprep.subr.bf16.mxu1 %v2471_v30 }
 0x8a0   : > { %2311 = vmatpush3.bf16.msra.mxu1 %v2472_v31 }
 0x8a1   : > { %2312 = vmatprep.subr.bf16.mxu1 %v2473_v10 }
 0x8a2   : > { %v2624_v7 = vpop.eup %2623 }
 0x8a3   : > { %v1660_v8 = vmul.f32 %v2624_v7, %v2622_v38  ;;  %v2292_v7 = vld [vmem:[%s3716_s9] ss:$0 sm:$0xff] }
 0x8a4   : > { %2313 = vmatpush3.bf16.msra.mxu1 %v2474_v39 }
 0x8a5   : > { %v1661_v21 = vpack.c.bf16 %v1660_v8, %v1660_v8  ;;  %2314 = vmatprep.subr.bf16.mxu1 %v2475_v56 }
 0x8a7   : > { %1803 = vmatmul.mubr.bf16.vlgmr.msra.gmra.mrb[32].mxu0 %v1661_v21 }
 0x8a8   : > { %2315 = vmatpush3.bf16.msra.mxu1 %v2476_v1  ;;  %2328 = vmatpush3.bf16.msra.mxu0 %v2477_v49 }
 0x8a9   : > { %2329 = vmatprep.subr.bf16.mxu0 %v2748_v51  ;;  %2335 = vmatprep.mubr.msk.bf16.mxu0 %vm2749_vm2, %v2748_v51 }
 0x8ac   : > { %2330 = vmatpush3.bf16.msra.mxu0 %v2478_v63 }
 0x8ad   : > { %2331 = vmatprep.subr.bf16.mxu0 %v2748_v51 }
 0x8b0   : > { %2332 = vmatpush3.bf16.msra.mxu0 %v2479_v57 }
 0x8b1   : > { %2333 = vmatprep.subr.bf16.mxu0 %v2748_v51 }
 0x8b4   : > { %2334 = vmatpush3.bf16.msra.mxu0 %v2480_v36 }
 0x97a   : > { %v1804_v15 = vpop.f32.mrb[32].mxu0 }
 0x97b   : > { %v1805_v16 = vadd.f32 %v1804_v15, %v1683_v12  ;;  %v1806_v17 = vpop.f32.mrb[33].mxu0 }
 0x97c   : > { %v1807_v18 = vadd.f32 %v1806_v17, %v1687_v14  ;;  %v1808_v48 = vpop.f32.mrb[34].mxu0 }
 0x97d   : > { %v1813_v60 = vmin.f32 %v1805_v16, 0.0  ;;  %v1809_v0 = vpop.f32.mrb[35].mxu0  ;;  %vm1811_vm0 = vcmp.gt.f32.partialorder %v1805_v16, 0.0 }
 0x97e   : > { %v1814_v44 = vmin.f32 %v1807_v18, 0.0  ;;  %vm1812_vm1 = vcmp.gt.f32.partialorder %v1807_v18, 0.0 }
 0x97f   : > { %v1815_v26 = vmul.f32 1.442695, %v1813_v60 }
 0x980   : > { %v1817_v5 = vmul.f32 1.442695, %v1814_v44 }
 0x981   : > { %2625 = vpow2.f32 %v1815_v26 }
 0x982   : > { %2627 = vpow2.f32 %v1817_v5 }
 0x98b   : > { %v2626_v32 = vpop.eup %2625 }
 0x98c   : > { %v2628_v33 = vpop.eup %2627  ;;  %v2272_v52 = vadd.f32 -1.0, %v2626_v32 }
 0x98d   : > { %v2273_v34 = vadd.f32 -1.0, %v2628_v33 }
 0x98e   : > { %v1821_v27 = vmul.f32 1.6732632, %v2272_v52 }
 0x98f   : > { %v1822_v62 = vmul.f32 1.6732632, %v2273_v34 }
 0x990   : > { %v1823_v41 = vsel %vm1811_vm0, %v1805_v16, %v1821_v27 }
 0x991   : > { %v1825_v46 = vmul.f32 1.050701, %v1823_v41  ;;  %v1824_v42 = vsel %vm1812_vm1, %v1807_v18, %v1822_v62 }
 0x992   : > { %v1826_v53 = vmul.f32 1.050701, %v1824_v42 }
 0x993   : > { %v1827_v47 = vpack.c.bf16 %v1825_v46, %v1825_v46 }
 0x994   : > { %v1828_v45 = vpack.c.bf16 %v1826_v53, %v1826_v53 }
 0x996   : > { %1996 = vmatprep.mubr.bf16.mxu1 %v1828_v45 }
 0x997   : > { %1997 = vmatmul.mubr.bf16.vlgmr.msra.gmra.mrb[32].mxu1 %v1827_v47 }
 0xa6a   : > { %v2316_v61 = vpop.f32.mrb[32].mxu1 }
 0xa6b   : > { %v2317_v55 = vpop.f32.mrb[33].mxu1 }
 0xa6c   : > { %v2318_v54 = vadd.f32 %v2317_v55, %v2316_v61  ;;  %v2319_v35 = vpop.f32.mrb[34].mxu1 }
 0xa6d   : > { %v2320_v58 = vpop.f32.mrb[35].mxu1 }
 0xa6e   : > { %v1999_v59 = vadd.f32 %v2318_v54, %v2274_v50 }
 0xa70   : > { %v2005_v40 = vmin.f32 %v1999_v59, 0.0  ;;  %vm2004_vm3 = vcmp.gt.f32.partialorder %v1999_v59, 0.0 }
 0xa72   : > { %v2006_v43 = vmul.f32 1.442695, %v2005_v40 }
 0xa74   : > { %2629 = vpow2.f32 %v2006_v43 }
 0xa7e   : > { %v2630_v3 = vpop.eup %2629 }
 0xa7f   : > { %v2291_v19 = vadd.f32 -1.0, %v2630_v3 }
 0xa81   : > { %v2009_v37 = vmul.f32 1.6732632, %v2291_v19 }
 0xa83   : > { %v2010_v20 = vsel %vm2004_vm3, %v1999_v59, %v2009_v37 }
 0xa84   : > { %v2011_v4 = vmul.f32 1.050701, %v2010_v20 }
 0xa86   : > { %v2012_v38 = vpack.c.bf16 %v2011_v4, %v2011_v4 }
 0xa88   : > { %2336 = vmatmul.mubr.msk.bf16.vlgmr.msra.gmra.mrb[36].mxu0 %vm2052_vm4, %v2012_v38 }
 0xb5b   : > { %v2090_v8 = vpop.f32.mrb[36].mxu0 }
 0xb5c   : > { %v2091_v21 = vadd.f32 %v2292_v7, %v2090_v8  ;;  %v2337_v22 = vpop.f32.mrb[37].mxu0 }
 0xb5d   : > { %v2093_v23 = vpop.f32.mrb[38].mxu0 }
 0xb5e   : > { %2097 = vst.msk [vmem:[%s382_s25] sm:$0xff] %vm2096_vm5, %v2091_v21  ;;  %v2338_v6 = vpop.f32.mrb[39].mxu0 }
 0xb5f PF: > { %s22_s13 = sadd.s32 1, %s2734_s13  }
 0xb60   : > { %p19_p9 = scmp.ge.s32.totalorder %s22_s13, 4  }
 0xb62   :  { %21 = sbr.rel (!%p19_p9) target bundleno = 2 (0x2), region = 99 }
 0xb69   :  { %2117 = vsyncpa [#allocation3], 1 }
 0xb6a   :  { %2119 = vsyncpa [#allocation3 + $0x1], 1 }
 0xb6b   :  { %2120 = vsyncpa [#allocation5], 1 }

</bundles_post_ra>
